<compile_context>
chip_gen: v7x
topology: tpu7x:2x2x1
jax: 0.10.0
libtpu: 0.0.40
codegen_flags: <defaults>
</compile_context>

<pallas_src>
import jax
import jax.numpy as jnp
from jax.experimental import pallas as pl
from jax.experimental.pallas import tpu as pltpu

LATENT = 128
H1, H2, OUT = 256, 512, 1024


def _round_up(n, m):
    return ((n + m - 1) // m) * m


def fcgen_kernel(x_ref, w1_ref, b1_ref, w2_ref, b2_ref, w3_ref, b3_ref, o_ref):
    # Layer 1: Linear(latent -> 256) + ReLU.  bf16 operands on the MXU, f32 acc.
    h = jnp.dot(x_ref[...].astype(jnp.bfloat16), w1_ref[...],
                preferred_element_type=jnp.float32)
    h = jnp.maximum(h + b1_ref[...], 0.0)          # epilogue kept in f32
    # Layer 2: Linear(256 -> 512) + ReLU
    h = jnp.dot(h.astype(jnp.bfloat16), w2_ref[...],
                preferred_element_type=jnp.float32)
    h = jnp.maximum(h + b2_ref[...], 0.0)
    # Layer 3: Linear(512 -> 1024)
    h = jnp.dot(h.astype(jnp.bfloat16), w3_ref[...],
                preferred_element_type=jnp.float32) + b3_ref[...]
    # TODO(synk): `self.transform` is not defined in the provided FCGenerator
    # source (inherited elsewhere in misgan); left as identity here.
    o_ref[...] = h.astype(o_ref.dtype)


def fc_generator(x, params, *, tb_max=1024, out_dtype=jnp.float32):
    """x: (B, LATENT) float32/bfloat16 -> (B, OUT) `out_dtype`."""
    w1, b1, w2, b2, w3, b3 = params
    B = x.shape[0]

    # ---- Adaptive batch tiling ---------------------------------------------
    # Big tiles amortize the ~0.35us per-grid-step overhead and reach the HBM
    # roofline; the tile is then shrunk to fit B with minimal padding, and we
    # keep at least 2 tiles (when B >= 16) so both v7x TensorCores get work.
    n_tiles = pl.cdiv(B, tb_max)
    if B >= 16:
        n_tiles = max(n_tiles, 2)
    tb = _round_up(pl.cdiv(B, n_tiles), 8)   # sublane-aligned batch tile
    b_pad = tb * n_tiles
    if b_pad != B:
        # Pad so every output tile is a full, lane-dense (tb, 1024) block.
        x = jnp.pad(x, ((0, b_pad - B), (0, 0)))
    grid = (n_tiles,)

    def resident(arr):
        # Constant block index across the grid -> Pallas fetches the block once
        # and keeps it resident in VMEM for all batch tiles.
        return pl.BlockSpec(arr.shape, lambda i: (0,) * arr.ndim)

    out_itemsize = jnp.dtype(out_dtype).itemsize
    weight_bytes = sum(int(p.size) * p.dtype.itemsize for p in params)

    flops = 2 * b_pad * (LATENT * H1 + H1 * H2 + H2 * OUT)
    bytes_accessed = (
        x.size * x.dtype.itemsize + weight_bytes + b_pad * OUT * out_itemsize)

    # Rough per-call VMEM footprint (double-buffered tiles + resident params +
    # f32 intermediates).  Only raise the scoped-VMEM limit if we would exceed
    # the ~32 MiB default (never triggers at tb_max=1024: ~19 MiB).
    vmem_est = (2 * weight_bytes
                + 2 * tb * LATENT * x.dtype.itemsize
                + 2 * tb * OUT * out_itemsize
                + tb * (H1 + H2 + OUT) * 4)
    compiler_kwargs = dict(
        # Batch tiles are independent -> megacore-shardable on v7x, neutral on
        # single-TC v5e/v6e.  (If profiling shows "parallel" is not actually
        # sharded across TCs, switch to pltpu.CORE_PARALLEL.)
        dimension_semantics=("parallel",),
    )
    if vmem_est > (30 << 20):
        compiler_kwargs["vmem_limit_bytes"] = int(vmem_est * 1.25)

    out = pl.pallas_call(
        fcgen_kernel,
        out_shape=jax.ShapeDtypeStruct((b_pad, OUT), out_dtype),
        grid_spec=pltpu.PrefetchScalarGridSpec(
            num_scalar_prefetch=0,
            grid=grid,
            in_specs=[
                pl.BlockSpec((tb, LATENT), lambda i: (i, 0)),   # activations: tiled
                resident(w1), resident(b1),
                resident(w2), resident(b2),
                resident(w3), resident(b3),
            ],
            out_specs=pl.BlockSpec((tb, OUT), lambda i: (i, 0)),
        ),
        compiler_params=pltpu.CompilerParams(**compiler_kwargs),
        cost_estimate=pl.CostEstimate(
            flops=flops, transcendentals=0, bytes_accessed=bytes_accessed),
    )(x, w1, b1, w2, b2, w3, b3)
    return out[:B]


def init_params(key):
    """Init mimicking PyTorch nn.Linear defaults (U[-1/sqrt(fan_in), 1/sqrt(fan_in)]).

    Weights stored as (in_features, out_features) in bfloat16 (halved HBM
    traffic, native MXU rate); biases kept float32 as (1, out_features) so the
    f32 epilogue broadcasts them as 2-D tiles.
    """
    def linear(k, fan_in, fan_out):
        kw, kb = jax.random.split(k)
        bound = 1.0 / jnp.sqrt(fan_in)
        w = jax.random.uniform(kw, (fan_in, fan_out), jnp.float32, -bound, bound)
        b = jax.random.uniform(kb, (1, fan_out), jnp.float32, -bound, bound)
        return w.astype(jnp.bfloat16), b

    k1, k2, k3 = jax.random.split(key, 3)
    w1, b1 = linear(k1, LATENT, H1)
    w2, b2 = linear(k2, H1, H2)
    w3, b3 = linear(k3, H2, OUT)
    return w1, b1, w2, b2, w3, b3


def fc_generator_ref(x, params):
    """Plain-JAX reference (same bf16-in / f32-accumulate math path)."""
    w1, b1, w2, b2, w3, b3 = params

    def lin(h, w, b):
        return jnp.dot(h.astype(jnp.bfloat16), w,
                       preferred_element_type=jnp.float32) + b

    h = jnp.maximum(lin(x, w1, b1), 0.0)
    h = jnp.maximum(lin(h, w2, b2), 0.0)
    return lin(h, w3, b3)


if __name__ == "__main__":
    key = jax.random.PRNGKey(0)
    kx, kp = jax.random.split(key)
    params = init_params(kp)

    # B=8: tiny single-tile batch.  B=260: ragged batch -> adaptive tiling pads
    # to 272 (2 tiles of 136) instead of 512.  B=2048: two full 1024-row tiles.
    for B in (8, 260, 2048):
        x = jax.random.normal(jax.random.fold_in(kx, B), (B, LATENT), jnp.float32)
        out = jax.block_until_ready(fc_generator(x, params))
        ref = fc_generator_ref(x, params)
        assert out.shape == (B, OUT), out.shape
        assert jnp.allclose(out, ref, atol=2e-2, rtol=2e-2), f"mismatch vs reference (B={B})"

    # bf16-output path (for a downstream `transform` that tolerates bf16):
    # halves the dominant HBM writeback stream on v6e/v7x.
    x = jax.random.normal(jax.random.fold_in(kx, 999), (260, LATENT), jnp.float32)
    out_bf16 = jax.block_until_ready(
        fc_generator(x, params, out_dtype=jnp.bfloat16))
    ref = fc_generator_ref(x, params)
    assert out_bf16.shape == (260, OUT)
    assert jnp.allclose(out_bf16.astype(jnp.float32), ref, atol=1e-1, rtol=5e-2), \
        "mismatch vs reference (bf16 output)"

    print("KERNEL_OK")
</pallas_src>

<mosaic_0001>
module attributes {stable_mosaic.version = 11 : i64} {
  func.func @fcgen_kernel(%arg0: i32, %arg1: memref<8x128xf32, #tpu.memory_space<vmem>>, %arg2: memref<128x256xbf16, #tpu.memory_space<vmem>>, %arg3: memref<1x256xf32, #tpu.memory_space<vmem>>, %arg4: memref<256x512xbf16, #tpu.memory_space<vmem>>, %arg5: memref<1x512xf32, #tpu.memory_space<vmem>>, %arg6: memref<512x1024xbf16, #tpu.memory_space<vmem>>, %arg7: memref<1x1024xf32, #tpu.memory_space<vmem>>, %arg8: memref<8x1024xf32, #tpu.memory_space<vmem>>) attributes {dimension_semantics = [#tpu.dimension_semantics<parallel>], iteration_bounds = array<i64: 1>, scalar_prefetch = 0 : i64, scratch_operands = 0 : i64, tpu.core_type = #tpu.core_type<tc>, window_params = [{transform_indices = @transform_0, window_bounds = array<i64: 8, 128>}, {pipeline_mode = #tpu.pipeline_mode<synchronous>, transform_indices = @transform_1, window_bounds = array<i64: 128, 256>}, {pipeline_mode = #tpu.pipeline_mode<synchronous>, transform_indices = @transform_2, window_bounds = array<i64: 1, 256>}, {pipeline_mode = #tpu.pipeline_mode<synchronous>, transform_indices = @transform_3, window_bounds = array<i64: 256, 512>}, {pipeline_mode = #tpu.pipeline_mode<synchronous>, transform_indices = @transform_4, window_bounds = array<i64: 1, 512>}, {pipeline_mode = #tpu.pipeline_mode<synchronous>, transform_indices = @transform_5, window_bounds = array<i64: 512, 1024>}, {pipeline_mode = #tpu.pipeline_mode<synchronous>, transform_indices = @transform_6, window_bounds = array<i64: 1, 1024>}, {transform_indices = @transform_7, window_bounds = array<i64: 8, 1024>}]} {
    %c0 = arith.constant 0 : index
    %c0_0 = arith.constant 0 : index
    %0 = vector.load %arg1[%c0, %c0_0] : memref<8x128xf32, #tpu.memory_space<vmem>>, vector<8x128xf32>
    %1 = arith.truncf %0 : vector<8x128xf32> to vector<8x128xbf16>
    %c0_1 = arith.constant 0 : index
    %c0_2 = arith.constant 0 : index
    %2 = vector.load %arg2[%c0_1, %c0_2] : memref<128x256xbf16, #tpu.memory_space<vmem>>, vector<128x256xbf16>
    %cst = arith.constant dense<0.000000e+00> : vector<8x256xf32>
    %3 = tpu.matmul %1, %2, %cst {dimension_numbers = #tpu.dot_dimension_numbers<[1], [0], [0], [1], [0, 0, 1, 1], [], []>} : vector<8x128xbf16>, vector<128x256xbf16>, vector<8x256xf32> -> vector<8x256xf32>
    %c0_3 = arith.constant 0 : index
    %c0_4 = arith.constant 0 : index
    %4 = vector.load %arg3[%c0_3, %c0_4] : memref<1x256xf32, #tpu.memory_space<vmem>>, vector<1x256xf32>
    %5 = vector.broadcast %4 : vector<1x256xf32> to vector<8x256xf32>
    %6 = arith.addf %3, %5 : vector<8x256xf32>
    %cst_5 = arith.constant 0.000000e+00 : f32
    %7 = vector.broadcast %cst_5 : f32 to vector<8x256xf32>
    %8 = arith.maximumf %6, %7 : vector<8x256xf32>
    %9 = arith.truncf %8 : vector<8x256xf32> to vector<8x256xbf16>
    %c0_6 = arith.constant 0 : index
    %c0_7 = arith.constant 0 : index
    %10 = vector.load %arg4[%c0_6, %c0_7] : memref<256x512xbf16, #tpu.memory_space<vmem>>, vector<256x512xbf16>
    %cst_8 = arith.constant dense<0.000000e+00> : vector<8x512xf32>
    %11 = tpu.matmul %9, %10, %cst_8 {dimension_numbers = #tpu.dot_dimension_numbers<[1], [0], [0], [1], [0, 0, 1, 1], [], []>} : vector<8x256xbf16>, vector<256x512xbf16>, vector<8x512xf32> -> vector<8x512xf32>
    %c0_9 = arith.constant 0 : index
    %c0_10 = arith.constant 0 : index
    %12 = vector.load %arg5[%c0_9, %c0_10] : memref<1x512xf32, #tpu.memory_space<vmem>>, vector<1x512xf32>
    %13 = vector.broadcast %12 : vector<1x512xf32> to vector<8x512xf32>
    %14 = arith.addf %11, %13 : vector<8x512xf32>
    %cst_11 = arith.constant 0.000000e+00 : f32
    %15 = vector.broadcast %cst_11 : f32 to vector<8x512xf32>
    %16 = arith.maximumf %14, %15 : vector<8x512xf32>
    %17 = arith.truncf %16 : vector<8x512xf32> to vector<8x512xbf16>
    %c0_12 = arith.constant 0 : index
    %c0_13 = arith.constant 0 : index
    %18 = vector.load %arg6[%c0_12, %c0_13] : memref<512x1024xbf16, #tpu.memory_space<vmem>>, vector<512x1024xbf16>
    %cst_14 = arith.constant dense<0.000000e+00> : vector<8x1024xf32>
    %19 = tpu.matmul %17, %18, %cst_14 {dimension_numbers = #tpu.dot_dimension_numbers<[1], [0], [0], [1], [0, 0, 1, 1], [], []>} : vector<8x512xbf16>, vector<512x1024xbf16>, vector<8x1024xf32> -> vector<8x1024xf32>
    %c0_15 = arith.constant 0 : index
    %c0_16 = arith.constant 0 : index
    %20 = vector.load %arg7[%c0_15, %c0_16] : memref<1x1024xf32, #tpu.memory_space<vmem>>, vector<1x1024xf32>
    %21 = vector.broadcast %20 : vector<1x1024xf32> to vector<8x1024xf32>
    %22 = arith.addf %19, %21 : vector<8x1024xf32>
    %c0_17 = arith.constant 0 : index
    %c0_18 = arith.constant 0 : index
    %23 = vector.load %arg8[%c0_17, %c0_18] : memref<8x1024xf32, #tpu.memory_space<vmem>>, vector<8x1024xf32>
    tpu.vector_store %arg8[%c0_17, %c0_18], %22 {strides = array<i32>} : memref<8x1024xf32, #tpu.memory_space<vmem>>, vector<8x1024xf32>,
    return
  }
  func.func @transform_0(%arg0: i32) -> (i32, i32) {
    %c0_i32 = arith.constant 0 : i32
    %c0_i32_0 = arith.constant 0 : i32
    return %arg0, %c0_i32 : i32, i32
  }
  func.func @transform_1(%arg0: i32) -> (i32, i32) {
    %c0_i32 = arith.constant 0 : i32
    %c0_i32_0 = arith.constant 0 : i32
    %c0_i32_1 = arith.constant 0 : i32
    return %c0_i32, %c0_i32_0 : i32, i32
  }
  func.func @transform_2(%arg0: i32) -> (i32, i32) {
    %c0_i32 = arith.constant 0 : i32
    %c0_i32_0 = arith.constant 0 : i32
    %c0_i32_1 = arith.constant 0 : i32
    return %c0_i32, %c0_i32_0 : i32, i32
  }
  func.func @transform_3(%arg0: i32) -> (i32, i32) {
    %c0_i32 = arith.constant 0 : i32
    %c0_i32_0 = arith.constant 0 : i32
    %c0_i32_1 = arith.constant 0 : i32
    return %c0_i32, %c0_i32_0 : i32, i32
  }
  func.func @transform_4(%arg0: i32) -> (i32, i32) {
    %c0_i32 = arith.constant 0 : i32
    %c0_i32_0 = arith.constant 0 : i32
    %c0_i32_1 = arith.constant 0 : i32
    return %c0_i32, %c0_i32_0 : i32, i32
  }
  func.func @transform_5(%arg0: i32) -> (i32, i32) {
    %c0_i32 = arith.constant 0 : i32
    %c0_i32_0 = arith.constant 0 : i32
    %c0_i32_1 = arith.constant 0 : i32
    return %c0_i32, %c0_i32_0 : i32, i32
  }
  func.func @transform_6(%arg0: i32) -> (i32, i32) {
    %c0_i32 = arith.constant 0 : i32
    %c0_i32_0 = arith.constant 0 : i32
    %c0_i32_1 = arith.constant 0 : i32
    return %c0_i32, %c0_i32_0 : i32, i32
  }
  func.func @transform_7(%arg0: i32) -> (i32, i32) {
    %c0_i32 = arith.constant 0 : i32
    %c0_i32_0 = arith.constant 0 : i32
    return %arg0, %c0_i32 : i32, i32
  }
}

</mosaic_0001>

<bundles_post_ra>
// kernel: tpu_custom_call.1
= control target key start
LH: loop header
LB: loop body
LE: loop exit
PB: predicated region body
PF: predicated region fallthrough
CT: control target
= control target key end

     0   :  { %12 = vsyncpa [#allocation3], 0  ;;  %s3455_s0 = inlined_call_operand.hbm [shape: f32[8,128], index: 0, kind: input, shape index: {}]   ;;  %s3456_s1 = inlined_call_operand.hbm [shape: bf16[128,256], index: 1, kind: input, shape index: {}]   ;;  %s3457_s2 = inlined_call_operand.vmem [shape: f32[1,256], index: 2, kind: input, shape index: {}]   ;;  %s3458_s3 = inlined_call_operand.hbm [shape: bf16[256,512], index: 3, kind: input, shape index: {}]   ;;  %s3459_s4 = inlined_call_operand.vmem [shape: f32[1,512], index: 4, kind: input, shape index: {}]   ;;  %s3460_s5 = inlined_call_operand.hbm [shape: bf16[512,1024], index: 5, kind: input, shape index: {}]   ;;  %s3461_s6 = inlined_call_operand.vmem [shape: f32[1,1024], index: 6, kind: input, shape index: {}]   ;;  %s3462_s7 = inlined_call_operand.hbm [shape: f32[8,1024], index: 7, kind: output, shape index: {}]  }
   0x1   :  { %13 = vsyncpa [#allocation6], 0 }
   0x2   :  { %14 = vsyncpa [#allocation9], 0 }
   0x3   :  { %15 = vsyncpa [#allocation4], 0  ;;  %s3273_s24 = smov [#allocation5]   ;;  %s3155_s28 = scalar_lea.hbm %s3456_s1, 2048 }
   0x4   :  { %s31_s25 = sshll.u32 %s3273_s24, 4  ;;  %p3156_p0 = scmp.ne.s32.totalorder %s3456_s1, %s3155_s28  ;;  %s32_s25 = int_to_ptr.vmem [resolvable:$true] %s31_s25 }
   0x5   :  { %p3159_p1 = scmp.lt.u32.totalorder %s3155_s28, %s3456_s1 }
   0x7   :  { %p3161_p2 = pnand %p3159_p1, %p3156_p0 }
   0x9   :  { %3164 = shalt.err (!%p3161_p2)
}
   0xa   :  { %s3165_s10 = scalar_lea.vmem %s32_s25, 2048  ;;  %p3170_p4 = scmp.lt.s32.totalorder %s32_s25, %s32_s25 }
   0xb   :  { %p3166_p3 = scmp.ne.s32.totalorder %s32_s25, %s3165_s10  ;;  %p3171_p5 = scmp.lt.s32.totalorder %s3165_s10, %s3165_s10 }
   0xd   :  { %p3172_p6 = por %p3171_p5, %p3170_p4 }
   0xf   :  { %p3173_p7 = pnand %p3172_p6, %p3166_p3 }
  0x11   :  { %3176 = shalt.err (!%p3173_p7)
}
  0x12   :  { %s3274_s11 = smov 128   ;;  %s3275_s12 = smov 8  }
  0x13   :  { %37 = dma.hbm_to_vmem [thread:$0]  %s3456_s1, 2048, %s32_s25, [#allocation6], %s3274_s11, %s3274_s11, %s3275_s12  }
  0x14   :  { %s3276_s15 = smov [#allocation2]   ;;  %s3277_s17 = smov [#allocation7]  }
  0x15   :  { %s22_s16 = sshll.u32 %s3276_s15, 4  ;;  %s45_s18 = sshll.u32 %s3277_s17, 4  ;;  %s23_s16 = int_to_ptr.vmem [resolvable:$true] %s22_s16  ;;  %s46_s18 = int_to_ptr.vmem [resolvable:$true] %s45_s18 }
  0x16   :  { %s3177_s21 = scalar_lea.hbm %s3455_s0, 128 }
  0x17   :  { %p3178_p8 = scmp.ne.s32.totalorder %s3455_s0, %s3177_s21  ;;  %p3181_p9 = scmp.lt.u32.totalorder %s3177_s21, %s3455_s0 }
  0x19   :  { %p3183_p10 = pnand %p3181_p9, %p3178_p8 }
  0x1b   :  { %3186 = shalt.err (!%p3183_p10)
}
  0x1c   :  { %s3187_s1 = scalar_lea.vmem %s23_s16, 128  ;;  %p3192_p12 = scmp.lt.s32.totalorder %s23_s16, %s23_s16 }
  0x1d   :  { %p3188_p11 = scmp.ne.s32.totalorder %s23_s16, %s3187_s1  ;;  %p3193_p13 = scmp.lt.s32.totalorder %s3187_s1, %s3187_s1 }
  0x1f   :  { %p3194_p0 = por %p3193_p13, %p3192_p12 }
  0x21   :  { %p3195_p1 = pnand %p3194_p0, %p3188_p11 }
  0x23   :  { %3198 = shalt.err (!%p3195_p1)
}
  0x24   :  { %25 = dma.hbm_to_vmem [thread:$0]  %s3455_s0, 128, %s23_s16, [#allocation3]  }
  0x25   :  { %s3199_s30 = scalar_lea.hbm %s3458_s3, 8192 }
  0x26   :  { %p3200_p2 = scmp.ne.s32.totalorder %s3458_s3, %s3199_s30  ;;  %p3203_p3 = scmp.lt.u32.totalorder %s3199_s30, %s3458_s3 }
  0x28   :  { %p3205_p4 = pnand %p3203_p3, %p3200_p2 }
  0x2a   :  { %3208 = shalt.err (!%p3205_p4)
}
  0x2b   :  { %s3209_s12 = scalar_lea.vmem %s46_s18, 8192  ;;  %p3214_p6 = scmp.lt.s32.totalorder %s46_s18, %s46_s18 }
  0x2c   :  { %p3210_p5 = scmp.ne.s32.totalorder %s46_s18, %s3209_s12  ;;  %p3215_p7 = scmp.lt.s32.totalorder %s3209_s12, %s3209_s12 }
  0x2e   :  { %p3216_p8 = por %p3215_p7, %p3214_p6 }
  0x30   :  { %p3217_p9 = pnand %p3216_p8, %p3210_p5 }
  0x32   :  { %3220 = shalt.err (!%p3217_p9)
}
  0x33   :  { %s3278_s0 = smov 256   ;;  %s3279_s13 = smov 16  }
  0x34   :  { %51 = dma.hbm_to_vmem [thread:$0]  %s3458_s3, 8192, %s46_s18, [#allocation6], %s3278_s0, %s3278_s0, %s3279_s13  }
  0x35   :  { %s3280_s16 = smov [#allocation8]   ;;  %s3221_s21 = scalar_lea.hbm %s3460_s5, 32768 }
  0x36   :  { %s59_s17 = sshll.u32 %s3280_s16, 4  ;;  %p3222_p10 = scmp.ne.s32.totalorder %s3460_s5, %s3221_s21  ;;  %s60_s17 = int_to_ptr.vmem [resolvable:$true] %s59_s17 }
  0x37   :  { %p3225_p11 = scmp.lt.u32.totalorder %s3221_s21, %s3460_s5 }
  0x39   :  { %p3227_p12 = pnand %p3225_p11, %p3222_p10 }
  0x3b   :  { %3230 = shalt.err (!%p3227_p12)
}
  0x3c   :  { %s3231_s1 = scalar_lea.vmem %s60_s17, 32768  ;;  %p3236_p0 = scmp.lt.s32.totalorder %s60_s17, %s60_s17 }
  0x3d   :  { %p3232_p13 = scmp.ne.s32.totalorder %s60_s17, %s3231_s1  ;;  %p3237_p1 = scmp.lt.s32.totalorder %s3231_s1, %s3231_s1 }
  0x3f   :  { %p3238_p2 = por %p3237_p1, %p3236_p0 }
  0x41   :  { %p3239_p3 = pnand %p3238_p2, %p3232_p13 }
  0x43   :  { %3242 = shalt.err (!%p3239_p3)
}
  0x44   :  { %s3281_s3 = smov 512   ;;  %s3282_s18 = smov 32  }
  0x45   :  { %65 = dma.hbm_to_vmem [thread:$0]  %s3460_s5, 32768, %s60_s17, [#allocation9], %s3281_s3, %s3281_s3, %s3282_s18  }
  0x46   :  { %3265 = dma.done.wait [#allocation3], 128  }
  0x47   :  { %3266 = vsyncadd [#allocation3], 4294967168 }
  0x48   :  { %3267 = dma.done.wait [#allocation6], 10240  }
  0x49   :  { %3268 = vsyncadd [#allocation6], 4294957056 }
  0x4a   :  { %3269 = dma.done.wait [#allocation9], 32768  }
  0x4b   :  { %3270 = vsyncadd [#allocation9], 4294934528  ;;  %v3283_v0 = vmov 0   ;;  %v3035_v1 = vld [vmem:[#allocation5 + $0x4] ss:$8 sps:$4 sm:$0xff]   ;;  %v81_v26 = vld [vmem:[#allocation2] sm:$0xff] }
  0x4c   :  { %223 = vmatprep.mubr.bf16.mxu0 %v3283_v0  ;;  %v3037_v2 = vld [vmem:[#allocation5] ss:$8 sps:$4 sm:$0xff]   ;;  %191 = vmatprep.subr.bf16.mxu0 %v3035_v1  ;;  %v3038_v3 = vld [vmem:[#allocation5 + $0x14] ss:$8 sps:$4 sm:$0xff]   ;;  %v3040_v4 = vld [vmem:[#allocation5 + $0x10] ss:$8 sps:$4 sm:$0xff]   ;;  %v82_v30 = vpack.c.bf16 %v81_v26, %v81_v26 }
  0x4d   :  { %192 = vmatpush1.bf16.msra.mxu0 %v3037_v2  ;;  %v3041_v5 = vld [vmem:[#allocation5 + $0x24] ss:$8 sps:$4 sm:$0xff]   ;;  %v3043_v6 = vld [vmem:[#allocation5 + $0x20] ss:$8 sps:$4 sm:$0xff]   ;;  %v3044_v7 = vld [vmem:[#allocation5 + $0x34] ss:$8 sps:$4 sm:$0xff]  }
  0x4e   :  { %193 = vmatprep.subr.bf16.mxu0 %v3038_v3  ;;  %v3046_v8 = vld [vmem:[#allocation5 + $0x30] ss:$8 sps:$4 sm:$0xff]   ;;  %v3059_v9 = vld [vmem:[#allocation7 + $0x4] ss:$16 sps:$4 sm:$0xff]   ;;  %v3049_v13 = vld [vmem:[#allocation5 + $0x40] ss:$8 sps:$4 sm:$0xff]  }
  0x4f   :  { %v3047_v10 = vld [vmem:[#allocation5 + $0x44] ss:$8 sps:$4 sm:$0xff]   ;;  %642 = vmatprep.subr.bf16.mxu1 %v3059_v9  ;;  %v3064_v11 = vld [vmem:[#allocation7] ss:$16 sps:$4 sm:$0xff]   ;;  %v3050_v14 = vld [vmem:[#allocation5 + $0x54] ss:$8 sps:$4 sm:$0xff]  }
  0x50   :  { %v3065_v12 = vld [vmem:[#allocation7 + $0x24] ss:$16 sps:$4 sm:$0xff]   ;;  %643 = vmatpush1.bf16.msra.mxu1 %v3064_v11  ;;  %v3070_v15 = vld [vmem:[#allocation7 + $0x20] ss:$16 sps:$4 sm:$0xff]   ;;  %v3063_v27 = vld [vmem:[#allocation7 + $0xc] ss:$16 sps:$4 sm:$0xff]  }
  0x51   :  { %194 = vmatpush1.bf16.msra.mxu0 %v3040_v4  ;;  %644 = vmatprep.subr.bf16.mxu1 %v3065_v12  ;;  %v3071_v16 = vld [vmem:[#allocation7 + $0x44] ss:$16 sps:$4 sm:$0xff]   ;;  %v3052_v17 = vld [vmem:[#allocation5 + $0x50] ss:$8 sps:$4 sm:$0xff]   ;;  %v3055_v21 = vld [vmem:[#allocation5 + $0x60] ss:$8 sps:$4 sm:$0xff]  }
  0x52   :  { %195 = vmatprep.subr.bf16.mxu0 %v3041_v5  ;;  %v3053_v18 = vld [vmem:[#allocation5 + $0x64] ss:$8 sps:$4 sm:$0xff]   ;;  %v3076_v19 = vld [vmem:[#allocation7 + $0x40] ss:$16 sps:$4 sm:$0xff]   ;;  %v3056_v22 = vld [vmem:[#allocation5 + $0x74] ss:$8 sps:$4 sm:$0xff]  }
  0x53   :  { %v3077_v20 = vld [vmem:[#allocation7 + $0x64] ss:$16 sps:$4 sm:$0xff]   ;;  %v3082_v23 = vld [vmem:[#allocation7 + $0x60] ss:$16 sps:$4 sm:$0xff]   ;;  %v3061_v31 = vld [vmem:[#allocation7 + $0x8] ss:$16 sps:$4 sm:$0xff]  }
  0x54   :  { %645 = vmatpush1.bf16.msra.mxu1 %v3070_v15  ;;  %v3083_v24 = vld [vmem:[#allocation7 + $0x84] ss:$16 sps:$4 sm:$0xff]   ;;  %v3058_v25 = vld [vmem:[#allocation5 + $0x70] ss:$8 sps:$4 sm:$0xff]   ;;  %v3069_v32 = vld [vmem:[#allocation7 + $0x2c] ss:$16 sps:$4 sm:$0xff]  }
  0x55   :  { %196 = vmatpush1.bf16.msra.mxu0 %v3043_v6  ;;  %646 = vmatprep.subr.bf16.mxu1 %v3071_v16  ;;  %v3088_v28 = vld [vmem:[#allocation7 + $0x80] ss:$16 sps:$4 sm:$0xff]   ;;  %v3089_v29 = vld [vmem:[#allocation7 + $0xa4] ss:$16 sps:$4 sm:$0xff]   ;;  %v3067_v35 = vld [vmem:[#allocation7 + $0x28] ss:$16 sps:$4 sm:$0xff]  }
  0x56   :  { %197 = vmatprep.subr.bf16.mxu0 %v3044_v7  ;;  %v3094_v33 = vld [vmem:[#allocation7 + $0xa0] ss:$16 sps:$4 sm:$0xff]   ;;  %v3095_v34 = vld [vmem:[#allocation7 + $0xc4] ss:$16 sps:$4 sm:$0xff]   ;;  %v3075_v36 = vld [vmem:[#allocation7 + $0x4c] ss:$16 sps:$4 sm:$0xff]  }
  0x57   :  { %v3100_v37 = vld [vmem:[#allocation7 + $0xc0] ss:$16 sps:$4 sm:$0xff]   ;;  %v3101_v38 = vld [vmem:[#allocation7 + $0xe4] ss:$16 sps:$4 sm:$0xff]   ;;  %v3073_v39 = vld [vmem:[#allocation7 + $0x48] ss:$16 sps:$4 sm:$0xff]  }
  0x58   :  { %647 = vmatpush1.bf16.msra.mxu1 %v3076_v19  ;;  %v3081_v40 = vld [vmem:[#allocation7 + $0x6c] ss:$16 sps:$4 sm:$0xff]   ;;  %v3106_v41 = vld [vmem:[#allocation7 + $0xe0] ss:$16 sps:$4 sm:$0xff]   ;;  %v3107_v42 = vld [vmem:[#allocation7 + $0x104] ss:$16 sps:$4 sm:$0xff]  }
  0x59   :  { %198 = vmatpush1.bf16.msra.mxu0 %v3046_v8  ;;  %648 = vmatprep.subr.bf16.mxu1 %v3077_v20  ;;  %v3079_v43 = vld [vmem:[#allocation7 + $0x68] ss:$16 sps:$4 sm:$0xff]   ;;  %v3087_v44 = vld [vmem:[#allocation7 + $0x8c] ss:$16 sps:$4 sm:$0xff]   ;;  %v3112_v45 = vld [vmem:[#allocation7 + $0x100] ss:$16 sps:$4 sm:$0xff]  }
  0x5a   :  { %199 = vmatprep.subr.bf16.mxu0 %v3047_v10  ;;  %v3113_v46 = vld [vmem:[#allocation7 + $0x124] ss:$16 sps:$4 sm:$0xff]   ;;  %v3085_v47 = vld [vmem:[#allocation7 + $0x88] ss:$16 sps:$4 sm:$0xff]   ;;  %v3118_v48 = vld [vmem:[#allocation7 + $0x120] ss:$16 sps:$4 sm:$0xff]  }
  0x5b   :  { %v3093_v49 = vld [vmem:[#allocation7 + $0xac] ss:$16 sps:$4 sm:$0xff]   ;;  %v3119_v50 = vld [vmem:[#allocation7 + $0x144] ss:$16 sps:$4 sm:$0xff]   ;;  %v3091_v51 = vld [vmem:[#allocation7 + $0xa8] ss:$16 sps:$4 sm:$0xff]  }
  0x5c   :  { %649 = vmatpush1.bf16.msra.mxu1 %v3082_v23  ;;  %v3124_v52 = vld [vmem:[#allocation7 + $0x140] ss:$16 sps:$4 sm:$0xff]   ;;  %v3099_v53 = vld [vmem:[#allocation7 + $0xcc] ss:$16 sps:$4 sm:$0xff]   ;;  %v3125_v54 = vld [vmem:[#allocation7 + $0x164] ss:$16 sps:$4 sm:$0xff]  }
  0x5d   :  { %200 = vmatpush1.bf16.msra.mxu0 %v3049_v13  ;;  %650 = vmatprep.subr.bf16.mxu1 %v3083_v24  ;;  %v3097_v55 = vld [vmem:[#allocation7 + $0xc8] ss:$16 sps:$4 sm:$0xff]   ;;  %v3130_v56 = vld [vmem:[#allocation7 + $0x160] ss:$16 sps:$4 sm:$0xff]   ;;  %v3105_v57 = vld [vmem:[#allocation7 + $0xec] ss:$16 sps:$4 sm:$0xff]  }
  0x5e   :  { %201 = vmatprep.subr.bf16.mxu0 %v3050_v14  ;;  %v3131_v58 = vld [vmem:[#allocation7 + $0x184] ss:$16 sps:$4 sm:$0xff]   ;;  %v3103_v59 = vld [vmem:[#allocation7 + $0xe8] ss:$16 sps:$4 sm:$0xff]   ;;  %v3136_v60 = vld [vmem:[#allocation7 + $0x180] ss:$16 sps:$4 sm:$0xff]  }
  0x5f   :  { %v3111_v61 = vld [vmem:[#allocation7 + $0x10c] ss:$16 sps:$4 sm:$0xff]   ;;  %v3137_v62 = vld [vmem:[#allocation7 + $0x1a4] ss:$16 sps:$4 sm:$0xff]   ;;  %v3109_v63 = vld [vmem:[#allocation7 + $0x108] ss:$16 sps:$4 sm:$0xff]  }
  0x60   :  { %651 = vmatpush1.bf16.msra.mxu1 %v3088_v28  ;;  %v3142_v0 = vld [vmem:[#allocation7 + $0x1a0] ss:$16 sps:$4 sm:$0xff]   ;;  %v3117_v1 = vld [vmem:[#allocation7 + $0x12c] ss:$16 sps:$4 sm:$0xff]   ;;  %v3115_v2 = vld [vmem:[#allocation7 + $0x128] ss:$16 sps:$4 sm:$0xff]  }
  0x61   :  { %202 = vmatpush1.bf16.msra.mxu0 %v3052_v17  ;;  %652 = vmatprep.subr.bf16.mxu1 %v3089_v29  ;;  %v3123_v3 = vld [vmem:[#allocation7 + $0x14c] ss:$16 sps:$4 sm:$0xff]   ;;  %v3121_v4 = vld [vmem:[#allocation7 + $0x148] ss:$16 sps:$4 sm:$0xff]   ;;  %v3143_v11 = vld [vmem:[#allocation7 + $0x1c4] ss:$16 sps:$4 sm:$0xff]  }
  0x62   :  { %203 = vmatprep.subr.bf16.mxu0 %v3053_v18  ;;  %v3129_v5 = vld [vmem:[#allocation7 + $0x16c] ss:$16 sps:$4 sm:$0xff]   ;;  %v3127_v6 = vld [vmem:[#allocation7 + $0x168] ss:$16 sps:$4 sm:$0xff]   ;;  %v3148_v14 = vld [vmem:[#allocation7 + $0x1c0] ss:$16 sps:$4 sm:$0xff]  }
  0x63   :  { %v3135_v7 = vld [vmem:[#allocation7 + $0x18c] ss:$16 sps:$4 sm:$0xff]   ;;  %v3133_v8 = vld [vmem:[#allocation7 + $0x188] ss:$16 sps:$4 sm:$0xff]   ;;  %v3149_v15 = vld [vmem:[#allocation7 + $0x1e4] ss:$16 sps:$4 sm:$0xff]  }
  0x64   :  { %653 = vmatpush1.bf16.msra.mxu1 %v3094_v33  ;;  %v3141_v9 = vld [vmem:[#allocation7 + $0x1ac] ss:$16 sps:$4 sm:$0xff]   ;;  %v3139_v10 = vld [vmem:[#allocation7 + $0x1a8] ss:$16 sps:$4 sm:$0xff]   ;;  %v3154_v18 = vld [vmem:[#allocation7 + $0x1e0] ss:$16 sps:$4 sm:$0xff]  }
  0x65   :  { %204 = vmatpush1.bf16.msra.mxu0 %v3055_v21  ;;  %654 = vmatprep.subr.bf16.mxu1 %v3095_v34  ;;  %v3147_v12 = vld [vmem:[#allocation7 + $0x1cc] ss:$16 sps:$4 sm:$0xff]   ;;  %v3145_v13 = vld [vmem:[#allocation7 + $0x1c8] ss:$16 sps:$4 sm:$0xff]   ;;  %v732_v19 = vld [vmem:[#allocation8] sm:$0xff] }
  0x66   :  { %205 = vmatprep.subr.bf16.mxu0 %v3056_v22  ;;  %v3153_v16 = vld [vmem:[#allocation7 + $0x1ec] ss:$16 sps:$4 sm:$0xff]   ;;  %v3151_v17 = vld [vmem:[#allocation7 + $0x1e8] ss:$16 sps:$4 sm:$0xff]   ;;  %v736_v20 = vld [vmem:[#allocation8 + $0x20] sm:$0xff] }
  0x67   :  { %v733_v21 = vld [vmem:[#allocation8 + $0x8] sm:$0xff]  ;;  %v2743_v22 = vcombine.low %v732_v19, %v736_v20  ;;  %v2744_v23 = vcombine.high %v732_v19, %v736_v20  ;;  %v784_v19 = vld [vmem:[#allocation8 + $0x1a0] sm:$0xff] }
  0x68   :  { %655 = vmatpush1.bf16.msra.mxu1 %v3100_v37  ;;  %v737_v24 = vld [vmem:[#allocation8 + $0x28] sm:$0xff] }
  0x69   :  { %206 = vmatpush1.bf16.msra.mxu0 %v3058_v25  ;;  %656 = vmatprep.subr.bf16.mxu1 %v3101_v38  ;;  %v2745_v25 = vcombine.low %v733_v21, %v737_v24  ;;  %v2746_v26 = vcombine.high %v733_v21, %v737_v24  ;;  %v781_v20 = vld [vmem:[#allocation8 + $0x188] sm:$0xff] }
  0x6a   :  { %683 = vmatprep.subr.bf16.mxu0 %v3063_v27  ;;  %v101_v27 = vlaneseq  ;;  %v785_v21 = vld [vmem:[#allocation8 + $0x1a8] sm:$0xff] }
  0x6c   :  { %224 = vmatmul.mubr.bf16.vlgmr.msra.gmra.mrb[0].mxu0 %v82_v30  ;;  %657 = vmatpush1.bf16.msra.mxu1 %v3106_v41  ;;  %v3373_v28 = vshrl.u32 %v101_v27, 7  ;;  %v99_v30 = vld [vmem:[%s3457_s2] sm:$0x3]  ;;  %v740_v41 = vld [vmem:[#allocation8 + $0x40] sm:$0xff] }
  0x6d   :  { %684 = vmatpush1.bf16.msra.mxu0 %v3061_v31  ;;  %658 = vmatprep.subr.bf16.mxu1 %v3107_v42  ;;  %v792_v27 = vld [vmem:[#allocation8 + $0x1e0] sm:$0xff] }
  0x6e   :  { %685 = vmatprep.subr.bf16.mxu0 %v3069_v32  ;;  %v3376_v29 = vsub.s32 0, %v3373_v28  ;;  %v3382_v31 = vsub.s32 1, %v3373_v28 }
  0x70   :  { %659 = vmatpush1.bf16.msra.mxu1 %v3112_v45  ;;  %v104_v32 = vrot.slane %v99_v30, %v3376_v29  ;;  %v108_v33 = vrot.slane %v99_v30, %v3382_v31  ;;  %v745_v45 = vld [vmem:[#allocation8 + $0x68] sm:$0xff] }
  0x71   :  { %686 = vmatpush1.bf16.msra.mxu0 %v3067_v35  ;;  %660 = vmatprep.subr.bf16.mxu1 %v3113_v46  ;;  %v789_v30 = vld [vmem:[#allocation8 + $0x1c8] sm:$0xff] }
  0x72   :  { %687 = vmatprep.subr.bf16.mxu0 %v3075_v36 }
  0x74   :  { %661 = vmatpush1.bf16.msra.mxu1 %v3118_v48 }
  0x75   :  { %688 = vmatpush1.bf16.msra.mxu0 %v3073_v39  ;;  %662 = vmatprep.subr.bf16.mxu1 %v3119_v50  ;;  %v748_v50 = vld [vmem:[#allocation8 + $0x80] sm:$0xff] }
  0x76   :  { %689 = vmatprep.subr.bf16.mxu0 %v3081_v40 }
  0x78   :  { %663 = vmatpush1.bf16.msra.mxu1 %v3124_v52  ;;  %v749_v52 = vld [vmem:[#allocation8 + $0x88] sm:$0xff] }
  0x79   :  { %690 = vmatpush1.bf16.msra.mxu0 %v3079_v43  ;;  %664 = vmatprep.subr.bf16.mxu1 %v3125_v54  ;;  %v744_v43 = vld [vmem:[#allocation8 + $0x60] sm:$0xff] }
  0x7a   :  { %691 = vmatprep.subr.bf16.mxu0 %v3087_v44  ;;  %v741_v44 = vld [vmem:[#allocation8 + $0x48] sm:$0xff]  ;;  %v2752_v48 = vcombine.high %v740_v41, %v744_v43  ;;  %v2751_v54 = vcombine.low %v740_v41, %v744_v43 }
  0x7c   :  { %665 = vmatpush1.bf16.msra.mxu1 %v3130_v56 }
  0x7d   :  { %692 = vmatpush1.bf16.msra.mxu0 %v3085_v47  ;;  %666 = vmatprep.subr.bf16.mxu1 %v3131_v58  ;;  %v756_v58 = vld [vmem:[#allocation8 + $0xc0] sm:$0xff] }
  0x7e   :  { %693 = vmatprep.subr.bf16.mxu0 %v3093_v49  ;;  %v2754_v49 = vcombine.high %v741_v44, %v745_v45 }
  0x80   :  { %667 = vmatpush1.bf16.msra.mxu1 %v3136_v60  ;;  %v757_v60 = vld [vmem:[#allocation8 + $0xc8] sm:$0xff] }
  0x81   :  { %694 = vmatpush1.bf16.msra.mxu0 %v3091_v51  ;;  %668 = vmatprep.subr.bf16.mxu1 %v3137_v62  ;;  %v752_v51 = vld [vmem:[#allocation8 + $0xa0] sm:$0xff] }
  0x82   :  { %695 = vmatprep.subr.bf16.mxu0 %v3099_v53  ;;  %v753_v53 = vld [vmem:[#allocation8 + $0xa8] sm:$0xff]  ;;  %v2760_v56 = vcombine.high %v748_v50, %v752_v51  ;;  %v2759_v62 = vcombine.low %v748_v50, %v752_v51 }
  0x84   :  { %669 = vmatpush1.bf16.msra.mxu1 %v3142_v0 }
  0x85   :  { %696 = vmatpush1.bf16.msra.mxu0 %v3097_v55  ;;  %670 = vmatprep.subr.bf16.mxu1 %v3143_v11  ;;  %v2753_v55 = vcombine.low %v741_v44, %v745_v45  ;;  %v776_v11 = vld [vmem:[#allocation8 + $0x160] sm:$0xff] }
  0x86   :  { %697 = vmatprep.subr.bf16.mxu0 %v3105_v57  ;;  %v2762_v57 = vcombine.high %v749_v52, %v753_v53  ;;  %v804_v45 = vld [vmem:[#allocation8 + $0x240] sm:$0xff] }
  0x88   :  { %671 = vmatpush1.bf16.msra.mxu1 %v3148_v14 }
  0x89   :  { %698 = vmatpush1.bf16.msra.mxu0 %v3103_v59  ;;  %672 = vmatprep.subr.bf16.mxu1 %v3149_v15  ;;  %v760_v59 = vld [vmem:[#allocation8 + $0xe0] sm:$0xff] }
  0x8a   :  { %699 = vmatprep.subr.bf16.mxu0 %v3111_v61  ;;  %v761_v61 = vld [vmem:[#allocation8 + $0xe8] sm:$0xff]  ;;  %v2768_v0 = vcombine.high %v756_v58, %v760_v59 }
  0x8c   :  { %673 = vmatpush1.bf16.msra.mxu1 %v3154_v18  ;;  %v780_v18 = vld [vmem:[#allocation8 + $0x180] sm:$0xff] }
  0x8d   :  { %700 = vmatpush1.bf16.msra.mxu0 %v3109_v63  ;;  %2310 = vmatprep.subr.bf16.mxu1 %v2744_v23  ;;  %v2761_v63 = vcombine.low %v749_v52, %v753_v53  ;;  %v2792_v24 = vcombine.high %v780_v18, %v784_v19  ;;  %v812_v53 = vld [vmem:[#allocation8 + $0x280] sm:$0xff] }
  0x8e   :  { %701 = vmatprep.subr.bf16.mxu0 %v3117_v1  ;;  %v2770_v1 = vcombine.high %v757_v60, %v761_v61 }
  0x91   :  { %702 = vmatpush1.bf16.msra.mxu0 %v3115_v2  ;;  %v764_v2 = vld [vmem:[#allocation8 + $0x100] sm:$0xff] }
  0x92   :  { %703 = vmatprep.subr.bf16.mxu0 %v3123_v3  ;;  %v768_v3 = vld [vmem:[#allocation8 + $0x120] sm:$0xff] }
  0x93   :  { %v2775_v14 = vcombine.low %v764_v2, %v768_v3 }
  0x95   :  { %704 = vmatpush1.bf16.msra.mxu0 %v3121_v4  ;;  %v765_v4 = vld [vmem:[#allocation8 + $0x108] sm:$0xff] }
  0x96   :  { %705 = vmatprep.subr.bf16.mxu0 %v3129_v5  ;;  %v769_v5 = vld [vmem:[#allocation8 + $0x128] sm:$0xff] }
  0x97   :  { %v2777_v15 = vcombine.low %v765_v4, %v769_v5 }
  0x99   :  { %706 = vmatpush1.bf16.msra.mxu0 %v3127_v6  ;;  %v2767_v6 = vcombine.low %v756_v58, %v760_v59 }
  0x9a   :  { %707 = vmatprep.subr.bf16.mxu0 %v3135_v7  ;;  %v2769_v7 = vcombine.low %v757_v60, %v761_v61  ;;  %v820_v61 = vld [vmem:[#allocation8 + $0x2c0] sm:$0xff] }
  0x9d   :  { %708 = vmatpush1.bf16.msra.mxu0 %v3133_v8  ;;  %v2776_v8 = vcombine.high %v764_v2, %v768_v3 }
  0x9e   :  { %709 = vmatprep.subr.bf16.mxu0 %v3141_v9  ;;  %v2778_v9 = vcombine.high %v765_v4, %v769_v5  ;;  %v828_v5 = vld [vmem:[#allocation8 + $0x300] sm:$0xff] }
  0xa1   :  { %710 = vmatpush1.bf16.msra.mxu0 %v3139_v10  ;;  %v772_v10 = vld [vmem:[#allocation8 + $0x140] sm:$0xff] }
  0xa2   :  { %711 = vmatprep.subr.bf16.mxu0 %v3147_v12  ;;  %v773_v12 = vld [vmem:[#allocation8 + $0x148] sm:$0xff] }
  0xa5   :  { %712 = vmatpush1.bf16.msra.mxu0 %v3145_v13  ;;  %v777_v13 = vld [vmem:[#allocation8 + $0x168] sm:$0xff] }
  0xa6   :  { %713 = vmatprep.subr.bf16.mxu0 %v3153_v16  ;;  %v2784_v16 = vcombine.high %v772_v10, %v776_v11  ;;  %v2785_v23 = vcombine.low %v773_v12, %v777_v13 }
  0xa9   :  { %714 = vmatpush1.bf16.msra.mxu0 %v3151_v17  ;;  %v2786_v17 = vcombine.high %v773_v12, %v777_v13  ;;  %v836_v13 = vld [vmem:[#allocation8 + $0x340] sm:$0xff] }
  0xaa   :  { %2392 = vmatprep.subr.bf16.mxu0 %v2746_v26  ;;  %v788_v26 = vld [vmem:[#allocation8 + $0x1c0] sm:$0xff] }
  0xab   :  { %v2799_v41 = vcombine.low %v788_v26, %v792_v27 }
 0x13f   :  { %v225_v34 = vpop.f32.mrb[0].mxu0 }
 0x140   :  { %v226_v35 = vadd.f32 %v225_v34, %v104_v32  ;;  %v227_v36 = vpop.f32.mrb[1].mxu0  ;;  %v793_v32 = vld [vmem:[#allocation8 + $0x1e8] sm:$0xff]  ;;  %v2793_v34 = vcombine.low %v781_v20, %v785_v21 }
 0x141   :  { %v228_v37 = vadd.f32 %v227_v36, %v108_v33  ;;  %v229_v38 = vpop.f32.mrb[2].mxu0  ;;  %v2791_v33 = vcombine.low %v780_v18, %v784_v19  ;;  %v2802_v36 = vcombine.high %v789_v30, %v793_v32 }
 0x142   :  { %v232_v39 = vmax.f32 %v226_v35, 0.0  ;;  %v230_v40 = vpop.f32.mrb[3].mxu0  ;;  %v2800_v35 = vcombine.high %v788_v26, %v792_v27  ;;  %v800_v38 = vld [vmem:[#allocation8 + $0x220] sm:$0xff]  ;;  %v849_v27 = vld [vmem:[#allocation8 + $0x3a8] sm:$0xff] }
 0x143   :  { %v233_v42 = vmax.f32 %v228_v37, 0.0  ;;  %v796_v37 = vld [vmem:[#allocation8 + $0x200] sm:$0xff]  ;;  %v801_v40 = vld [vmem:[#allocation8 + $0x228] sm:$0xff] }
 0x144   :  { %v234_v47 = vpack.c.bf16 %v232_v39, %v232_v39  ;;  %v797_v39 = vld [vmem:[#allocation8 + $0x208] sm:$0xff]  ;;  %v2808_v43 = vcombine.high %v796_v37, %v800_v38 }
 0x145   :  { %v235_v46 = vpack.c.bf16 %v233_v42, %v233_v42  ;;  %v2801_v42 = vcombine.low %v789_v30, %v793_v32  ;;  %v2810_v44 = vcombine.high %v797_v39, %v801_v40  ;;  %v2809_v50 = vcombine.low %v797_v39, %v801_v40 }
 0x147   :  { %674 = vmatprep.mubr.bf16.mxu1 %v235_v46  ;;  %715 = vmatprep.mubr.bf16.mxu0 %v235_v46  ;;  %v808_v46 = vld [vmem:[#allocation8 + $0x260] sm:$0xff] }
 0x148   :  { %675 = vmatmul.mubr.bf16.vlgmr.msra.gmra.mrb[0].mxu1 %v234_v47  ;;  %716 = vmatmul.mubr.bf16.vlgmr.msra.gmra.mrb[4].mxu0 %v234_v47  ;;  %v805_v47 = vld [vmem:[#allocation8 + $0x248] sm:$0xff]  ;;  %v2816_v51 = vcombine.high %v804_v45, %v808_v46 }
 0x149   :  { %2311 = vmatpush1.bf16.msra.mxu1 %v2743_v22  ;;  %2393 = vmatpush1.bf16.msra.mxu0 %v2745_v25  ;;  %v2783_v22 = vcombine.low %v772_v10, %v776_v11  ;;  %v2794_v25 = vcombine.high %v781_v20, %v785_v21 }
 0x14a   :  { %2312 = vmatprep.subr.bf16.mxu1 %v2752_v48  ;;  %2394 = vmatprep.subr.bf16.mxu0 %v2754_v49  ;;  %v809_v48 = vld [vmem:[#allocation8 + $0x268] sm:$0xff]  ;;  %v2807_v49 = vcombine.low %v796_v37, %v800_v38 }
 0x14b   :  { %v2818_v52 = vcombine.high %v805_v47, %v809_v48  ;;  %v2817_v58 = vcombine.low %v805_v47, %v809_v48  ;;  %v857_v38 = vld [vmem:[#allocation8 + $0x3e8] sm:$0xff] }
 0x14d   :  { %2313 = vmatpush1.bf16.msra.mxu1 %v2751_v54  ;;  %2395 = vmatpush1.bf16.msra.mxu0 %v2753_v55  ;;  %v816_v54 = vld [vmem:[#allocation8 + $0x2a0] sm:$0xff]  ;;  %v813_v55 = vld [vmem:[#allocation8 + $0x288] sm:$0xff] }
 0x14e   :  { %2314 = vmatprep.subr.bf16.mxu1 %v2760_v56  ;;  %2396 = vmatprep.subr.bf16.mxu0 %v2762_v57  ;;  %v817_v56 = vld [vmem:[#allocation8 + $0x2a8] sm:$0xff]  ;;  %v2815_v57 = vcombine.low %v804_v45, %v808_v46  ;;  %v2824_v59 = vcombine.high %v812_v53, %v816_v54 }
 0x14f   :  { %v2826_v60 = vcombine.high %v813_v55, %v817_v56  ;;  %v2825_v2 = vcombine.low %v813_v55, %v817_v56  ;;  %v865_v46 = vld [vmem:[#allocation8 + $0x428] sm:$0xff] }
 0x151   :  { %2315 = vmatpush1.bf16.msra.mxu1 %v2759_v62  ;;  %2397 = vmatpush1.bf16.msra.mxu0 %v2761_v63  ;;  %v824_v62 = vld [vmem:[#allocation8 + $0x2e0] sm:$0xff]  ;;  %v821_v63 = vld [vmem:[#allocation8 + $0x2c8] sm:$0xff] }
 0x152   :  { %2316 = vmatprep.subr.bf16.mxu1 %v2768_v0  ;;  %2398 = vmatprep.subr.bf16.mxu0 %v2770_v1  ;;  %v825_v0 = vld [vmem:[#allocation8 + $0x2e8] sm:$0xff]  ;;  %v2823_v1 = vcombine.low %v812_v53, %v816_v54  ;;  %v2832_v3 = vcombine.high %v820_v61, %v824_v62 }
 0x153   :  { %v2834_v4 = vcombine.high %v821_v63, %v825_v0  ;;  %v2833_v10 = vcombine.low %v821_v63, %v825_v0 }
 0x155   :  { %2317 = vmatpush1.bf16.msra.mxu1 %v2767_v6  ;;  %2399 = vmatpush1.bf16.msra.mxu0 %v2769_v7  ;;  %v832_v6 = vld [vmem:[#allocation8 + $0x320] sm:$0xff]  ;;  %v829_v7 = vld [vmem:[#allocation8 + $0x308] sm:$0xff] }
 0x156   :  { %2318 = vmatprep.subr.bf16.mxu1 %v2776_v8  ;;  %2400 = vmatprep.subr.bf16.mxu0 %v2778_v9  ;;  %v833_v8 = vld [vmem:[#allocation8 + $0x328] sm:$0xff]  ;;  %v2831_v9 = vcombine.low %v820_v61, %v824_v62  ;;  %v2840_v11 = vcombine.high %v828_v5, %v832_v6 }
 0x157   :  { %v2842_v12 = vcombine.high %v829_v7, %v833_v8  ;;  %v2841_v18 = vcombine.low %v829_v7, %v833_v8  ;;  %v869_v7 = vld [vmem:[#allocation8 + $0x448] sm:$0xff] }
 0x158   :  { %v873_v8 = vld [vmem:[#allocation8 + $0x468] sm:$0xff] }
 0x159   :  { %2319 = vmatpush1.bf16.msra.mxu1 %v2775_v14  ;;  %2401 = vmatpush1.bf16.msra.mxu0 %v2777_v15  ;;  %v840_v14 = vld [vmem:[#allocation8 + $0x360] sm:$0xff]  ;;  %v837_v15 = vld [vmem:[#allocation8 + $0x348] sm:$0xff] }
 0x15a   :  { %2320 = vmatprep.subr.bf16.mxu1 %v2784_v16  ;;  %2402 = vmatprep.subr.bf16.mxu0 %v2786_v17  ;;  %v841_v16 = vld [vmem:[#allocation8 + $0x368] sm:$0xff]  ;;  %v2839_v17 = vcombine.low %v828_v5, %v832_v6  ;;  %v2848_v19 = vcombine.high %v836_v13, %v840_v14  ;;  %v2847_v21 = vcombine.low %v836_v13, %v840_v14  ;;  %v872_v6 = vld [vmem:[#allocation8 + $0x460] sm:$0xff] }
 0x15b   :  { %v2850_v20 = vcombine.high %v837_v15, %v841_v16  ;;  %v2882_v13 = vcombine.high %v869_v7, %v873_v8  ;;  %v880_v14 = vld [vmem:[#allocation8 + $0x4a0] sm:$0xff] }
 0x15d   :  { %2321 = vmatpush1.bf16.msra.mxu1 %v2783_v22  ;;  %2403 = vmatpush1.bf16.msra.mxu0 %v2785_v23  ;;  %v2849_v22 = vcombine.low %v837_v15, %v841_v16  ;;  %v844_v23 = vld [vmem:[#allocation8 + $0x380] sm:$0xff]  ;;  %v877_v15 = vld [vmem:[#allocation8 + $0x488] sm:$0xff] }
 0x15e   :  { %2322 = vmatprep.subr.bf16.mxu1 %v2792_v24  ;;  %2404 = vmatprep.subr.bf16.mxu0 %v2794_v25  ;;  %v848_v24 = vld [vmem:[#allocation8 + $0x3a0] sm:$0xff]  ;;  %v845_v25 = vld [vmem:[#allocation8 + $0x388] sm:$0xff] }
 0x15f   :  { %v2856_v26 = vcombine.high %v844_v23, %v848_v24  ;;  %v2855_v30 = vcombine.low %v844_v23, %v848_v24  ;;  %v2857_v32 = vcombine.low %v845_v25, %v849_v27  ;;  %v881_v16 = vld [vmem:[#allocation8 + $0x4a8] sm:$0xff]  ;;  %v888_v23 = vld [vmem:[#allocation8 + $0x4e0] sm:$0xff] }
 0x160   :  { %v885_v24 = vld [vmem:[#allocation8 + $0x4c8] sm:$0xff] }
 0x161   :  { %2323 = vmatpush1.bf16.msra.mxu1 %v2791_v33  ;;  %2405 = vmatpush1.bf16.msra.mxu0 %v2793_v34  ;;  %v2858_v33 = vcombine.high %v845_v25, %v849_v27  ;;  %v852_v34 = vld [vmem:[#allocation8 + $0x3c0] sm:$0xff]  ;;  %v889_v25 = vld [vmem:[#allocation8 + $0x4e8] sm:$0xff]  ;;  %v2889_v27 = vcombine.low %v877_v15, %v881_v16 }
 0x162   :  { %2324 = vmatprep.subr.bf16.mxu1 %v2800_v35  ;;  %2406 = vmatprep.subr.bf16.mxu0 %v2802_v36  ;;  %v856_v35 = vld [vmem:[#allocation8 + $0x3e0] sm:$0xff]  ;;  %v853_v36 = vld [vmem:[#allocation8 + $0x3c8] sm:$0xff] }
 0x163   :  { %v2864_v37 = vcombine.high %v852_v34, %v856_v35  ;;  %v2863_v39 = vcombine.low %v852_v34, %v856_v35  ;;  %v2865_v40 = vcombine.low %v853_v36, %v857_v38  ;;  %v896_v34 = vld [vmem:[#allocation8 + $0x520] sm:$0xff]  ;;  %v893_v35 = vld [vmem:[#allocation8 + $0x508] sm:$0xff] }
 0x165   :  { %2325 = vmatpush1.bf16.msra.mxu1 %v2799_v41  ;;  %2407 = vmatpush1.bf16.msra.mxu0 %v2801_v42  ;;  %v2866_v41 = vcombine.high %v853_v36, %v857_v38  ;;  %v860_v42 = vld [vmem:[#allocation8 + $0x400] sm:$0xff]  ;;  %v897_v36 = vld [vmem:[#allocation8 + $0x528] sm:$0xff]  ;;  %v2897_v38 = vcombine.low %v885_v24, %v889_v25 }
 0x166   :  { %2326 = vmatprep.subr.bf16.mxu1 %v2808_v43  ;;  %2408 = vmatprep.subr.bf16.mxu0 %v2810_v44  ;;  %v864_v43 = vld [vmem:[#allocation8 + $0x420] sm:$0xff]  ;;  %v861_v44 = vld [vmem:[#allocation8 + $0x408] sm:$0xff] }
 0x167   :  { %v2872_v45 = vcombine.high %v860_v42, %v864_v43  ;;  %v2871_v47 = vcombine.low %v860_v42, %v864_v43  ;;  %v2873_v48 = vcombine.low %v861_v44, %v865_v46  ;;  %v904_v42 = vld [vmem:[#allocation8 + $0x560] sm:$0xff]  ;;  %v901_v43 = vld [vmem:[#allocation8 + $0x548] sm:$0xff] }
 0x169   :  { %2327 = vmatpush1.bf16.msra.mxu1 %v2807_v49  ;;  %2409 = vmatpush1.bf16.msra.mxu0 %v2809_v50  ;;  %v2874_v49 = vcombine.high %v861_v44, %v865_v46  ;;  %v3389_v50 = vld [vmem:[%s3459_s4] sm:$0xf]  ;;  %v905_v44 = vld [vmem:[#allocation8 + $0x568] sm:$0xff]  ;;  %v2905_v46 = vcombine.low %v893_v35, %v897_v36 }
 0x16a   :  { %2328 = vmatprep.subr.bf16.mxu1 %v2816_v51  ;;  %2410 = vmatprep.subr.bf16.mxu0 %v2818_v52  ;;  %v316_v51 = vsub.s32 3, %v3373_v28  ;;  %v305_v52 = vrot.slane %v3389_v50, %v3376_v29  ;;  %v309_v53 = vrot.slane %v3389_v50, %v3382_v31 }
 0x16c   :  { %v317_v54 = vrot.slane %v3389_v50, %v316_v51 }
 0x16d   :  { %2329 = vmatpush1.bf16.msra.mxu1 %v2815_v57  ;;  %2411 = vmatpush1.bf16.msra.mxu0 %v2817_v58 }
 0x16e   :  { %2330 = vmatprep.subr.bf16.mxu1 %v2824_v59  ;;  %2412 = vmatprep.subr.bf16.mxu0 %v2826_v60 }
 0x171   :  { %2331 = vmatpush1.bf16.msra.mxu1 %v2823_v1  ;;  %2413 = vmatpush1.bf16.msra.mxu0 %v2825_v2 }
 0x172   :  { %2332 = vmatprep.subr.bf16.mxu1 %v2832_v3  ;;  %2414 = vmatprep.subr.bf16.mxu0 %v2834_v4  ;;  %v868_v4 = vld [vmem:[#allocation8 + $0x440] sm:$0xff] }
 0x175   :  { %2333 = vmatpush1.bf16.msra.mxu1 %v2831_v9  ;;  %2415 = vmatpush1.bf16.msra.mxu0 %v2833_v10 }
 0x176   :  { %2334 = vmatprep.subr.bf16.mxu1 %v2840_v11  ;;  %2416 = vmatprep.subr.bf16.mxu0 %v2842_v12  ;;  %v876_v11 = vld [vmem:[#allocation8 + $0x480] sm:$0xff]  ;;  %v2880_v12 = vcombine.high %v868_v4, %v872_v6 }
 0x179   :  { %2335 = vmatpush1.bf16.msra.mxu1 %v2839_v17  ;;  %2417 = vmatpush1.bf16.msra.mxu0 %v2841_v18  ;;  %v2879_v18 = vcombine.low %v868_v4, %v872_v6  ;;  %v924_v4 = vld [vmem:[#allocation8 + $0x600] sm:$0xff]  ;;  %v925_v6 = vld [vmem:[#allocation8 + $0x608] sm:$0xff] }
 0x17a   :  { %2336 = vmatprep.subr.bf16.mxu1 %v2848_v19  ;;  %2418 = vmatprep.subr.bf16.mxu0 %v2850_v20  ;;  %v2881_v19 = vcombine.low %v869_v7, %v873_v8  ;;  %v2888_v20 = vcombine.high %v876_v11, %v880_v14  ;;  %v929_v7 = vld [vmem:[#allocation8 + $0x628] sm:$0xff] }
 0x17d   :  { %2337 = vmatpush1.bf16.msra.mxu1 %v2847_v21  ;;  %2419 = vmatpush1.bf16.msra.mxu0 %v2849_v22  ;;  %v2890_v21 = vcombine.high %v877_v15, %v881_v16  ;;  %v884_v22 = vld [vmem:[#allocation8 + $0x4c0] sm:$0xff]  ;;  %v933_v16 = vld [vmem:[#allocation8 + $0x648] sm:$0xff] }
 0x17e   :  { %2338 = vmatprep.subr.bf16.mxu1 %v2856_v26  ;;  %2420 = vmatprep.subr.bf16.mxu0 %v2858_v33  ;;  %v2887_v26 = vcombine.low %v876_v11, %v880_v14  ;;  %v892_v33 = vld [vmem:[#allocation8 + $0x500] sm:$0xff] }
 0x17f   :  { %v932_v14 = vld [vmem:[#allocation8 + $0x640] sm:$0xff] }
 0x180   :  { %v936_v15 = vld [vmem:[#allocation8 + $0x660] sm:$0xff] }
 0x181   :  { %2339 = vmatpush1.bf16.msra.mxu1 %v2855_v30  ;;  %2421 = vmatpush1.bf16.msra.mxu0 %v2857_v32  ;;  %v2896_v30 = vcombine.high %v884_v22, %v888_v23  ;;  %v2898_v32 = vcombine.high %v885_v24, %v889_v25  ;;  %v944_v24 = vld [vmem:[#allocation8 + $0x6a0] sm:$0xff]  ;;  %v941_v25 = vld [vmem:[#allocation8 + $0x688] sm:$0xff] }
 0x182   :  { %2340 = vmatprep.subr.bf16.mxu1 %v2864_v37  ;;  %2422 = vmatprep.subr.bf16.mxu0 %v2866_v41  ;;  %v2895_v37 = vcombine.low %v884_v22, %v888_v23  ;;  %v900_v41 = vld [vmem:[#allocation8 + $0x540] sm:$0xff] }
 0x183   :  { %v940_v23 = vld [vmem:[#allocation8 + $0x680] sm:$0xff] }
 0x185   :  { %2341 = vmatpush1.bf16.msra.mxu1 %v2863_v39  ;;  %2423 = vmatpush1.bf16.msra.mxu0 %v2865_v40  ;;  %v2904_v39 = vcombine.high %v892_v33, %v896_v34  ;;  %v2906_v40 = vcombine.high %v893_v35, %v897_v36  ;;  %v952_v35 = vld [vmem:[#allocation8 + $0x6e0] sm:$0xff]  ;;  %v949_v36 = vld [vmem:[#allocation8 + $0x6c8] sm:$0xff] }
 0x186   :  { %2351 = vmatprep.subr.bf16.mxu1 %v2872_v45  ;;  %2433 = vmatprep.subr.bf16.mxu0 %v2874_v49  ;;  %v2903_v45 = vcombine.low %v892_v33, %v896_v34  ;;  %v908_v49 = vld [vmem:[#allocation8 + $0x580] sm:$0xff] }
 0x187   :  { %v948_v34 = vld [vmem:[#allocation8 + $0x6c0] sm:$0xff] }
 0x21b   :  { %v676_v55 = vpop.f32.mrb[0].mxu1  ;;  %v3399_v56 = vpop.f32.mrb[4].mxu0 }
 0x21c   :  { %v677_v57 = vadd.f32 %v676_v55, %v305_v52  ;;  %v678_v58 = vpop.f32.mrb[1].mxu1  ;;  %v719_v59 = vpop.f32.mrb[5].mxu0  ;;  %v912_v52 = vld [vmem:[#allocation8 + $0x5a0] sm:$0xff]  ;;  %v2911_v55 = vcombine.low %v900_v41, %v904_v42 }
 0x21d   :  { %v679_v60 = vadd.f32 %v678_v58, %v309_v53  ;;  %v720_v61 = vadd.f32 %v719_v59, %v317_v54  ;;  %v680_v62 = vpop.f32.mrb[2].mxu1  ;;  %v721_v63 = vpop.f32.mrb[6].mxu0  ;;  %v909_v53 = vld [vmem:[#allocation8 + $0x588] sm:$0xff]  ;;  %v2920_v58 = vcombine.high %v908_v49, %v912_v52 }
 0x21e   :  { %v724_v0 = vmax.f32 %v677_v57, 0.0  ;;  %v681_v1 = vpop.f32.mrb[3].mxu1  ;;  %v722_v2 = vpop.f32.mrb[7].mxu0  ;;  %v913_v54 = vld [vmem:[#allocation8 + $0x5a8] sm:$0xff]  ;;  %v2913_v57 = vcombine.low %v901_v43, %v905_v44 }
 0x21f   :  { %v725_v3 = vmax.f32 %v679_v60, 0.0  ;;  %v727_v5 = vmax.f32 %v720_v61, 0.0  ;;  %v2922_v59 = vcombine.high %v909_v53, %v913_v54  ;;  %v916_v60 = vld [vmem:[#allocation8 + $0x5c0] sm:$0xff]  ;;  %v917_v62 = vld [vmem:[#allocation8 + $0x5c8] sm:$0xff]  ;;  %v2921_v1 = vcombine.low %v909_v53, %v913_v54 }
 0x220   :  { %v3403_v10 = vpack.c.bf16 %v724_v0, %v724_v0  ;;  %v920_v61 = vld [vmem:[#allocation8 + $0x5e0] sm:$0xff]  ;;  %v921_v63 = vld [vmem:[#allocation8 + $0x5e8] sm:$0xff]  ;;  %v2919_v0 = vcombine.low %v908_v49, %v912_v52 }
 0x221   :  { %v3401_v9 = vpack.c.bf16 %v725_v3, %v725_v3  ;;  %v3407_v17 = vpack.c.bf16 %v727_v5, %v727_v5  ;;  %v2928_v2 = vcombine.high %v916_v60, %v920_v61  ;;  %v2930_v3 = vcombine.high %v917_v62, %v921_v63  ;;  %v928_v5 = vld [vmem:[#allocation8 + $0x620] sm:$0xff]  ;;  %v965_v54 = vld [vmem:[#allocation8 + $0x748] sm:$0xff] }
 0x222   :  { %v2927_v8 = vcombine.low %v916_v60, %v920_v61  ;;  %v2929_v11 = vcombine.low %v917_v62, %v921_v63  ;;  %v964_v52 = vld [vmem:[#allocation8 + $0x740] sm:$0xff] }
 0x223   :  { %2342 = vmatprep.mubr.bf16.mxu1 %v3401_v9  ;;  %2424 = vmatprep.mubr.bf16.mxu0 %v3401_v9  ;;  %v968_v53 = vld [vmem:[#allocation8 + $0x760] sm:$0xff] }
 0x224   :  { %2343 = vmatmul.mubr.bf16.vlgmr.msra.gmra.mrb[4].mxu1 %v3403_v10  ;;  %2425 = vmatmul.mubr.bf16.vlgmr.msra.gmra.mrb[8].mxu0 %v3403_v10  ;;  %v2976_v60 = vcombine.high %v964_v52, %v968_v53  ;;  %v972_v62 = vld [vmem:[#allocation8 + $0x780] sm:$0xff] }
 0x225   :  { %2352 = vmatpush1.bf16.msra.mxu1 %v2871_v47  ;;  %2434 = vmatpush1.bf16.msra.mxu0 %v2873_v48  ;;  %v2912_v47 = vcombine.high %v900_v41, %v904_v42  ;;  %v2914_v48 = vcombine.high %v901_v43, %v905_v44  ;;  %v956_v42 = vld [vmem:[#allocation8 + $0x700] sm:$0xff]  ;;  %v957_v44 = vld [vmem:[#allocation8 + $0x708] sm:$0xff] }
 0x226   :  { %2383 = vmatprep.mubr.bf16.mxu1 %v3407_v17  ;;  %2465 = vmatprep.mubr.bf16.mxu0 %v3407_v17  ;;  %v960_v43 = vld [vmem:[#allocation8 + $0x720] sm:$0xff] }
 0x227   :  { %2353 = vmatprep.subr.bf16.mxu1 %v2880_v12  ;;  %2435 = vmatprep.subr.bf16.mxu0 %v2882_v13  ;;  %v2936_v12 = vcombine.high %v924_v4, %v928_v5  ;;  %v2938_v13 = vcombine.high %v925_v6, %v929_v7  ;;  %v976_v63 = vld [vmem:[#allocation8 + $0x7a0] sm:$0xff] }
 0x229   :  { %2354 = vmatpush1.bf16.msra.mxu1 %v2879_v18  ;;  %2436 = vmatpush1.bf16.msra.mxu0 %v2881_v19  ;;  %v937_v18 = vld [vmem:[#allocation8 + $0x668] sm:$0xff]  ;;  %v2935_v19 = vcombine.low %v924_v4, %v928_v5  ;;  %v2984_v5 = vcombine.high %v972_v62, %v976_v63 }
 0x22a   :  { %2355 = vmatprep.subr.bf16.mxu1 %v2888_v20  ;;  %2437 = vmatprep.subr.bf16.mxu0 %v2890_v21  ;;  %v2937_v20 = vcombine.low %v925_v6, %v929_v7  ;;  %v2944_v21 = vcombine.high %v932_v14, %v936_v15  ;;  %v2946_v22 = vcombine.high %v933_v16, %v937_v18  ;;  %v980_v7 = vld [vmem:[#allocation8 + $0x7c0] sm:$0xff] }
 0x22d   :  { %2356 = vmatpush1.bf16.msra.mxu1 %v2887_v26  ;;  %2438 = vmatpush1.bf16.msra.mxu0 %v2889_v27  ;;  %v945_v26 = vld [vmem:[#allocation8 + $0x6a8] sm:$0xff]  ;;  %v2943_v27 = vcombine.low %v932_v14, %v936_v15 }
 0x22e   :  { %2357 = vmatprep.subr.bf16.mxu1 %v2896_v30  ;;  %2439 = vmatprep.subr.bf16.mxu0 %v2898_v32  ;;  %v2945_v30 = vcombine.low %v933_v16, %v937_v18  ;;  %v2952_v32 = vcombine.high %v940_v23, %v944_v24  ;;  %v2954_v33 = vcombine.high %v941_v25, %v945_v26 }
 0x231   :  { %2358 = vmatpush1.bf16.msra.mxu1 %v2895_v37  ;;  %2440 = vmatpush1.bf16.msra.mxu0 %v2897_v38  ;;  %v953_v37 = vld [vmem:[#allocation8 + $0x6e8] sm:$0xff]  ;;  %v2951_v38 = vcombine.low %v940_v23, %v944_v24 }
 0x232   :  { %2359 = vmatprep.subr.bf16.mxu1 %v2904_v39  ;;  %2441 = vmatprep.subr.bf16.mxu0 %v2906_v40  ;;  %v2953_v39 = vcombine.low %v941_v25, %v945_v26  ;;  %v2960_v40 = vcombine.high %v948_v34, %v952_v35  ;;  %v2962_v41 = vcombine.high %v949_v36, %v953_v37 }
 0x235   :  { %2360 = vmatpush1.bf16.msra.mxu1 %v2903_v45  ;;  %2442 = vmatpush1.bf16.msra.mxu0 %v2905_v46  ;;  %v961_v45 = vld [vmem:[#allocation8 + $0x728] sm:$0xff]  ;;  %v2959_v46 = vcombine.low %v948_v34, %v952_v35 }
 0x236   :  { %2361 = vmatprep.subr.bf16.mxu1 %v2912_v47  ;;  %2443 = vmatprep.subr.bf16.mxu0 %v2914_v48  ;;  %v2961_v47 = vcombine.low %v949_v36, %v953_v37  ;;  %v2968_v48 = vcombine.high %v956_v42, %v960_v43  ;;  %v2970_v49 = vcombine.high %v957_v44, %v961_v45 }
 0x239   :  { %2362 = vmatpush1.bf16.msra.mxu1 %v2911_v55  ;;  %2444 = vmatpush1.bf16.msra.mxu0 %v2913_v57  ;;  %v969_v55 = vld [vmem:[#allocation8 + $0x768] sm:$0xff]  ;;  %v2967_v57 = vcombine.low %v956_v42, %v960_v43 }
 0x23a   :  { %2363 = vmatprep.subr.bf16.mxu1 %v2920_v58  ;;  %2445 = vmatprep.subr.bf16.mxu0 %v2922_v59  ;;  %v2969_v58 = vcombine.low %v957_v44, %v961_v45  ;;  %v312_v59 = vsub.s32 2, %v3373_v28  ;;  %v2978_v61 = vcombine.high %v965_v54, %v969_v55 }
 0x23c   :  { %v313_v4 = vrot.slane %v3389_v50, %v312_v59  ;;  %v738_v50 = vld [vmem:[#allocation8 + $0x30] sm:$0xff] }
 0x23d   :  { %2364 = vmatpush1.bf16.msra.mxu1 %v2919_v0  ;;  %2446 = vmatpush1.bf16.msra.mxu0 %v2921_v1  ;;  %v973_v0 = vld [vmem:[#allocation8 + $0x788] sm:$0xff] }
 0x23e   :  { %2365 = vmatprep.subr.bf16.mxu1 %v2928_v2  ;;  %2447 = vmatprep.subr.bf16.mxu0 %v2930_v3  ;;  %v977_v1 = vld [vmem:[#allocation8 + $0x7a8] sm:$0xff]  ;;  %v2975_v2 = vcombine.low %v964_v52, %v968_v53  ;;  %v2977_v3 = vcombine.low %v965_v54, %v969_v55  ;;  %v718_v15 = vadd.f32 %v3399_v56, %v313_v4  ;;  %v743_v56 = vld [vmem:[#allocation8 + $0x58] sm:$0xff] }
 0x23f   :  { %v2986_v6 = vcombine.high %v973_v0, %v977_v1  ;;  %v2985_v14 = vcombine.low %v973_v0, %v977_v1  ;;  %v774_v1 = vld [vmem:[#allocation8 + $0x150] sm:$0xff]  ;;  %v779_v4 = vld [vmem:[#allocation8 + $0x178] sm:$0xff] }
 0x240   :  { %v726_v24 = vmax.f32 %v718_v15, 0.0 }
 0x241   :  { %2366 = vmatpush1.bf16.msra.mxu1 %v2927_v8  ;;  %2448 = vmatpush1.bf16.msra.mxu0 %v2929_v11  ;;  %v984_v8 = vld [vmem:[#allocation8 + $0x7e0] sm:$0xff]  ;;  %v981_v11 = vld [vmem:[#allocation8 + $0x7c8] sm:$0xff] }
 0x242   :  { %2367 = vmatprep.subr.bf16.mxu1 %v2936_v12  ;;  %2449 = vmatprep.subr.bf16.mxu0 %v2938_v13  ;;  %v985_v12 = vld [vmem:[#allocation8 + $0x7e8] sm:$0xff]  ;;  %v2983_v13 = vcombine.low %v972_v62, %v976_v63  ;;  %v2992_v16 = vcombine.high %v980_v7, %v984_v8  ;;  %v3418_v34 = vpack.c.bf16 %v726_v24, %v726_v24 }
 0x243   :  { %v2994_v18 = vcombine.high %v981_v11, %v985_v12  ;;  %v2993_v23 = vcombine.low %v981_v11, %v985_v12  ;;  %v782_v11 = vld [vmem:[#allocation8 + $0x190] sm:$0xff] }
 0x244   :  { %v786_v12 = vld [vmem:[#allocation8 + $0x1b0] sm:$0xff] }
 0x245   :  { %2368 = vmatpush1.bf16.msra.mxu1 %v2935_v19  ;;  %2450 = vmatpush1.bf16.msra.mxu0 %v2937_v20  ;;  %v734_v19 = vld [vmem:[#allocation8 + $0x10] sm:$0xff]  ;;  %v735_v20 = vld [vmem:[#allocation8 + $0x18] sm:$0xff] }
 0x246   :  { %2369 = vmatprep.subr.bf16.mxu1 %v2944_v21  ;;  %2451 = vmatprep.subr.bf16.mxu0 %v2946_v22  ;;  %v739_v21 = vld [vmem:[#allocation8 + $0x38] sm:$0xff]  ;;  %v2991_v22 = vcombine.low %v980_v7, %v984_v8  ;;  %v2748_v25 = vcombine.high %v734_v19, %v738_v50 }
 0x247   :  { %v2750_v26 = vcombine.high %v735_v20, %v739_v21  ;;  %v2749_v35 = vcombine.low %v735_v20, %v739_v21  ;;  %v794_v20 = vld [vmem:[#allocation8 + $0x1f0] sm:$0xff]  ;;  %v791_v21 = vld [vmem:[#allocation8 + $0x1d8] sm:$0xff] }
 0x249   :  { %2370 = vmatpush1.bf16.msra.mxu1 %v2943_v27  ;;  %2452 = vmatpush1.bf16.msra.mxu0 %v2945_v30  ;;  %v742_v27 = vld [vmem:[#allocation8 + $0x50] sm:$0xff] }
 0x24a   :  { %2371 = vmatprep.subr.bf16.mxu1 %v2952_v32  ;;  %2453 = vmatprep.subr.bf16.mxu0 %v2954_v33  ;;  %v746_v30 = vld [vmem:[#allocation8 + $0x70] sm:$0xff]  ;;  %v747_v32 = vld [vmem:[#allocation8 + $0x78] sm:$0xff]  ;;  %v2747_v33 = vcombine.low %v734_v19, %v738_v50 }
 0x24b   :  { %v2756_v36 = vcombine.high %v742_v27, %v746_v30  ;;  %v2758_v37 = vcombine.high %v743_v56, %v747_v32  ;;  %v2755_v42 = vcombine.low %v742_v27, %v746_v30  ;;  %v2757_v43 = vcombine.low %v743_v56, %v747_v32  ;;  %v790_v50 = vld [vmem:[#allocation8 + $0x1d0] sm:$0xff]  ;;  %v799_v56 = vld [vmem:[#allocation8 + $0x218] sm:$0xff] }
 0x24c   :  { %v798_v27 = vld [vmem:[#allocation8 + $0x210] sm:$0xff]  ;;  %v803_v32 = vld [vmem:[#allocation8 + $0x238] sm:$0xff] }
 0x24d   :  { %2372 = vmatpush1.bf16.msra.mxu1 %v2951_v38  ;;  %2454 = vmatpush1.bf16.msra.mxu0 %v2953_v39  ;;  %v750_v38 = vld [vmem:[#allocation8 + $0x90] sm:$0xff] }
 0x24e   :  { %2373 = vmatprep.subr.bf16.mxu1 %v2960_v40  ;;  %2455 = vmatprep.subr.bf16.mxu0 %v2962_v41  ;;  %v754_v39 = vld [vmem:[#allocation8 + $0xb0] sm:$0xff]  ;;  %v751_v40 = vld [vmem:[#allocation8 + $0x98] sm:$0xff] }
 0x24f   :  { %v755_v41 = vld [vmem:[#allocation8 + $0xb8] sm:$0xff]  ;;  %v2764_v44 = vcombine.high %v750_v38, %v754_v39  ;;  %v2763_v52 = vcombine.low %v750_v38, %v754_v39  ;;  %v802_v30 = vld [vmem:[#allocation8 + $0x230] sm:$0xff] }
 0x250   :  { %v2766_v45 = vcombine.high %v751_v40, %v755_v41  ;;  %v2765_v53 = vcombine.low %v751_v40, %v755_v41  ;;  %v806_v38 = vld [vmem:[#allocation8 + $0x250] sm:$0xff]  ;;  %v807_v40 = vld [vmem:[#allocation8 + $0x258] sm:$0xff] }
 0x251   :  { %2374 = vmatpush1.bf16.msra.mxu1 %v2959_v46  ;;  %2456 = vmatpush1.bf16.msra.mxu0 %v2961_v47  ;;  %v758_v46 = vld [vmem:[#allocation8 + $0xd0] sm:$0xff]  ;;  %v811_v41 = vld [vmem:[#allocation8 + $0x278] sm:$0xff] }
 0x252   :  { %2375 = vmatprep.subr.bf16.mxu1 %v2968_v48  ;;  %2457 = vmatprep.subr.bf16.mxu0 %v2970_v49  ;;  %v762_v47 = vld [vmem:[#allocation8 + $0xf0] sm:$0xff]  ;;  %v759_v48 = vld [vmem:[#allocation8 + $0xd8] sm:$0xff] }
 0x253   :  { %v763_v49 = vld [vmem:[#allocation8 + $0xf8] sm:$0xff]  ;;  %v2772_v54 = vcombine.high %v758_v46, %v762_v47  ;;  %v810_v39 = vld [vmem:[#allocation8 + $0x270] sm:$0xff] }
 0x254   :  { %v2774_v55 = vcombine.high %v759_v48, %v763_v49  ;;  %v2773_v62 = vcombine.low %v759_v48, %v763_v49  ;;  %v815_v48 = vld [vmem:[#allocation8 + $0x298] sm:$0xff] }
 0x255   :  { %2376 = vmatpush1.bf16.msra.mxu1 %v2967_v57  ;;  %2458 = vmatpush1.bf16.msra.mxu0 %v2969_v58  ;;  %v766_v57 = vld [vmem:[#allocation8 + $0x110] sm:$0xff]  ;;  %v819_v49 = vld [vmem:[#allocation8 + $0x2b8] sm:$0xff] }
 0x256   :  { %2377 = vmatprep.subr.bf16.mxu1 %v2976_v60  ;;  %2459 = vmatprep.subr.bf16.mxu0 %v2978_v61  ;;  %v770_v58 = vld [vmem:[#allocation8 + $0x130] sm:$0xff]  ;;  %v771_v60 = vld [vmem:[#allocation8 + $0x138] sm:$0xff]  ;;  %v2771_v61 = vcombine.low %v758_v46, %v762_v47 }
 0x257   :  { %v2780_v63 = vcombine.high %v766_v57, %v770_v58  ;;  %v814_v46 = vld [vmem:[#allocation8 + $0x290] sm:$0xff] }
 0x258   :  { %v818_v47 = vld [vmem:[#allocation8 + $0x2b0] sm:$0xff] }
 0x259   :  { %2378 = vmatpush1.bf16.msra.mxu1 %v2975_v2  ;;  %2460 = vmatpush1.bf16.msra.mxu0 %v2977_v3  ;;  %v778_v2 = vld [vmem:[#allocation8 + $0x170] sm:$0xff]  ;;  %v775_v3 = vld [vmem:[#allocation8 + $0x158] sm:$0xff] }
 0x25a   :  { %2379 = vmatprep.subr.bf16.mxu1 %v2984_v5  ;;  %2461 = vmatprep.subr.bf16.mxu0 %v2986_v6  ;;  %v2779_v5 = vcombine.low %v766_v57, %v770_v58  ;;  %v2788_v7 = vcombine.high %v774_v1, %v778_v2  ;;  %v2790_v8 = vcombine.high %v775_v3, %v779_v4  ;;  %v822_v57 = vld [vmem:[#allocation8 + $0x2d0] sm:$0xff] }
 0x25b   :  { %v2787_v15 = vcombine.low %v774_v1, %v778_v2  ;;  %v826_v58 = vld [vmem:[#allocation8 + $0x2f0] sm:$0xff] }
 0x25c   :  { %v830_v1 = vld [vmem:[#allocation8 + $0x310] sm:$0xff] }
 0x25d   :  { %2380 = vmatpush1.bf16.msra.mxu1 %v2983_v13  ;;  %2462 = vmatpush1.bf16.msra.mxu0 %v2985_v14  ;;  %v783_v13 = vld [vmem:[#allocation8 + $0x198] sm:$0xff]  ;;  %v834_v2 = vld [vmem:[#allocation8 + $0x330] sm:$0xff] }
 0x25e   :  { %2381 = vmatprep.subr.bf16.mxu1 %v2992_v16  ;;  %2463 = vmatprep.subr.bf16.mxu0 %v2994_v18  ;;  %v787_v14 = vld [vmem:[#allocation8 + $0x1b8] sm:$0xff]  ;;  %v2789_v16 = vcombine.low %v775_v3, %v779_v4  ;;  %v2796_v18 = vcombine.high %v782_v11, %v786_v12 }
 0x25f   :  { %v2798_v19 = vcombine.high %v783_v13, %v787_v14  ;;  %v2797_v24 = vcombine.low %v783_v13, %v787_v14  ;;  %v831_v3 = vld [vmem:[#allocation8 + $0x318] sm:$0xff] }
 0x260   :  { %v835_v4 = vld [vmem:[#allocation8 + $0x338] sm:$0xff] }
 0x261   :  { %2382 = vmatpush1.bf16.msra.mxu1 %v2991_v22  ;;  %2464 = vmatpush1.bf16.msra.mxu0 %v2993_v23  ;;  %v795_v22 = vld [vmem:[#allocation8 + $0x1f8] sm:$0xff]  ;;  %v2795_v23 = vcombine.low %v782_v11, %v786_v12  ;;  %v838_v11 = vld [vmem:[#allocation8 + $0x350] sm:$0xff] }
 0x262   :  { %2474 = vmatprep.subr.bf16.mxu1 %v2748_v25  ;;  %2556 = vmatprep.subr.bf16.mxu0 %v2750_v26  ;;  %v2804_v25 = vcombine.high %v790_v50, %v794_v20  ;;  %v2806_v26 = vcombine.high %v791_v21, %v795_v22  ;;  %v842_v12 = vld [vmem:[#allocation8 + $0x370] sm:$0xff]  ;;  %v839_v13 = vld [vmem:[#allocation8 + $0x358] sm:$0xff] }
 0x263   :  { %v843_v14 = vld [vmem:[#allocation8 + $0x378] sm:$0xff] }
 0x264   :  { %2384 = vmatmul.mubr.bf16.vlgmr.msra.gmra.mrb[4].mxu1 %v3418_v34  ;;  %2466 = vmatmul.mubr.bf16.vlgmr.msra.gmra.mrb[8].mxu0 %v3418_v34 }
 0x265   :  { %2475 = vmatpush1.bf16.msra.mxu1 %v2747_v33  ;;  %2506 = vmatprep.mubr.bf16.mxu1 %v3401_v9  ;;  %v2803_v33 = vcombine.low %v790_v50, %v794_v20  ;;  %v846_v50 = vld [vmem:[#allocation8 + $0x390] sm:$0xff] }
 0x266   :  { %2557 = vmatpush1.bf16.msra.mxu0 %v2749_v35  ;;  %2588 = vmatprep.mubr.bf16.mxu0 %v3401_v9  ;;  %v767_v9 = vld [vmem:[#allocation8 + $0x118] sm:$0xff]  ;;  %v2805_v35 = vcombine.low %v791_v21, %v795_v22  ;;  %v850_v20 = vld [vmem:[#allocation8 + $0x3b0] sm:$0xff] }
 0x267   :  { %2476 = vmatprep.subr.bf16.mxu1 %v2756_v36  ;;  %2558 = vmatprep.subr.bf16.mxu0 %v2758_v37  ;;  %v2782_v0 = vcombine.high %v767_v9, %v771_v60  ;;  %v2781_v6 = vcombine.low %v767_v9, %v771_v60  ;;  %v2812_v36 = vcombine.high %v798_v27, %v802_v30  ;;  %v823_v9 = vld [vmem:[#allocation8 + $0x2d8] sm:$0xff] }
 0x268   :  { %v2814_v37 = vcombine.high %v799_v56, %v803_v32  ;;  %v827_v60 = vld [vmem:[#allocation8 + $0x2f8] sm:$0xff] }
 0x269   :  { %2477 = vmatpush1.bf16.msra.mxu1 %v2755_v42  ;;  %v2811_v42 = vcombine.low %v798_v27, %v802_v30  ;;  %v847_v21 = vld [vmem:[#allocation8 + $0x398] sm:$0xff]  ;;  %v854_v27 = vld [vmem:[#allocation8 + $0x3d0] sm:$0xff] }
 0x26a   :  { %2559 = vmatpush1.bf16.msra.mxu0 %v2757_v43  ;;  %2478 = vmatprep.subr.bf16.mxu1 %v2764_v44  ;;  %v2813_v43 = vcombine.low %v799_v56, %v803_v32  ;;  %v2820_v44 = vcombine.high %v806_v38, %v810_v39  ;;  %v851_v22 = vld [vmem:[#allocation8 + $0x3b8] sm:$0xff]  ;;  %v858_v30 = vld [vmem:[#allocation8 + $0x3f0] sm:$0xff] }
 0x26b   :  { %2560 = vmatprep.subr.bf16.mxu0 %v2766_v45  ;;  %v2822_v45 = vcombine.high %v807_v40, %v811_v41  ;;  %v855_v56 = vld [vmem:[#allocation8 + $0x3d8] sm:$0xff] }
 0x26c   :  { %v859_v32 = vld [vmem:[#allocation8 + $0x3f8] sm:$0xff] }
 0x26d   :  { %2479 = vmatpush1.bf16.msra.mxu1 %v2763_v52  ;;  %v2819_v52 = vcombine.low %v806_v38, %v810_v39  ;;  %v862_v38 = vld [vmem:[#allocation8 + $0x410] sm:$0xff] }
 0x26e   :  { %2561 = vmatpush1.bf16.msra.mxu0 %v2765_v53  ;;  %2480 = vmatprep.subr.bf16.mxu1 %v2772_v54  ;;  %v2821_v53 = vcombine.low %v807_v40, %v811_v41  ;;  %v2828_v54 = vcombine.high %v814_v46, %v818_v47  ;;  %v866_v39 = vld [vmem:[#allocation8 + $0x430] sm:$0xff]  ;;  %v863_v40 = vld [vmem:[#allocation8 + $0x418] sm:$0xff] }
 0x26f   :  { %2562 = vmatprep.subr.bf16.mxu0 %v2774_v55  ;;  %v2830_v55 = vcombine.high %v815_v48, %v819_v49  ;;  %v867_v41 = vld [vmem:[#allocation8 + $0x438] sm:$0xff] }
 0x271   :  { %2481 = vmatpush1.bf16.msra.mxu1 %v2771_v61  ;;  %v2827_v61 = vcombine.low %v814_v46, %v818_v47  ;;  %v870_v46 = vld [vmem:[#allocation8 + $0x450] sm:$0xff] }
 0x272   :  { %2563 = vmatpush1.bf16.msra.mxu0 %v2773_v62  ;;  %2482 = vmatprep.subr.bf16.mxu1 %v2780_v63  ;;  %v2829_v62 = vcombine.low %v815_v48, %v819_v49  ;;  %v2836_v63 = vcombine.high %v822_v57, %v826_v58  ;;  %v874_v47 = vld [vmem:[#allocation8 + $0x470] sm:$0xff]  ;;  %v2875_v48 = vcombine.low %v862_v38, %v866_v39  ;;  %v871_v49 = vld [vmem:[#allocation8 + $0x458] sm:$0xff] }
 0x273   :  { %2564 = vmatprep.subr.bf16.mxu0 %v2782_v0  ;;  %v2838_v0 = vcombine.high %v823_v9, %v827_v60 }
 0x275   :  { %2483 = vmatpush1.bf16.msra.mxu1 %v2779_v5  ;;  %v2835_v5 = vcombine.low %v822_v57, %v826_v58  ;;  %v882_v57 = vld [vmem:[#allocation8 + $0x4b0] sm:$0xff] }
 0x276   :  { %2565 = vmatpush1.bf16.msra.mxu0 %v2781_v6  ;;  %2484 = vmatprep.subr.bf16.mxu1 %v2788_v7  ;;  %v2837_v6 = vcombine.low %v823_v9, %v827_v60  ;;  %v2844_v7 = vcombine.high %v830_v1, %v834_v2  ;;  %v879_v9 = vld [vmem:[#allocation8 + $0x498] sm:$0xff] }
 0x277   :  { %2566 = vmatprep.subr.bf16.mxu0 %v2790_v8  ;;  %v2846_v8 = vcombine.high %v831_v3, %v835_v4  ;;  %v883_v60 = vld [vmem:[#allocation8 + $0x4b8] sm:$0xff] }
 0x279   :  { %2485 = vmatpush1.bf16.msra.mxu1 %v2787_v15  ;;  %v2843_v15 = vcombine.low %v830_v1, %v834_v2  ;;  %v886_v1 = vld [vmem:[#allocation8 + $0x4d0] sm:$0xff] }
 0x27a   :  { %2567 = vmatpush1.bf16.msra.mxu0 %v2789_v16  ;;  %2486 = vmatprep.subr.bf16.mxu1 %v2796_v18  ;;  %v2845_v16 = vcombine.low %v831_v3, %v835_v4  ;;  %v2852_v18 = vcombine.high %v838_v11, %v842_v12  ;;  %v890_v2 = vld [vmem:[#allocation8 + $0x4f0] sm:$0xff]  ;;  %v887_v3 = vld [vmem:[#allocation8 + $0x4d8] sm:$0xff] }
 0x27b   :  { %2568 = vmatprep.subr.bf16.mxu0 %v2798_v19  ;;  %v2854_v19 = vcombine.high %v839_v13, %v843_v14  ;;  %v891_v4 = vld [vmem:[#allocation8 + $0x4f8] sm:$0xff] }
 0x27d   :  { %2487 = vmatpush1.bf16.msra.mxu1 %v2795_v23  ;;  %v2851_v23 = vcombine.low %v838_v11, %v842_v12  ;;  %v898_v11 = vld [vmem:[#allocation8 + $0x530] sm:$0xff]  ;;  %v895_v12 = vld [vmem:[#allocation8 + $0x518] sm:$0xff] }
 0x27e   :  { %2569 = vmatpush1.bf16.msra.mxu0 %v2797_v24  ;;  %2488 = vmatprep.subr.bf16.mxu1 %v2804_v25  ;;  %v2853_v24 = vcombine.low %v839_v13, %v843_v14  ;;  %v2860_v25 = vcombine.high %v846_v50, %v850_v20  ;;  %v899_v13 = vld [vmem:[#allocation8 + $0x538] sm:$0xff]  ;;  %v2901_v14 = vcombine.low %v887_v3, %v891_v4 }
 0x27f   :  { %2570 = vmatprep.subr.bf16.mxu0 %v2806_v26  ;;  %v2862_v26 = vcombine.high %v847_v21, %v851_v22 }
 0x281   :  { %2489 = vmatpush1.bf16.msra.mxu1 %v2803_v33  ;;  %v2859_v33 = vcombine.low %v846_v50, %v850_v20  ;;  %v903_v50 = vld [vmem:[#allocation8 + $0x558] sm:$0xff] }
 0x282   :  { %2571 = vmatpush1.bf16.msra.mxu0 %v2805_v35  ;;  %2490 = vmatprep.subr.bf16.mxu1 %v2812_v36  ;;  %v2861_v35 = vcombine.low %v847_v21, %v851_v22  ;;  %v2868_v36 = vcombine.high %v854_v27, %v858_v30  ;;  %v907_v20 = vld [vmem:[#allocation8 + $0x578] sm:$0xff]  ;;  %v2909_v22 = vcombine.low %v895_v12, %v899_v13 }
 0x283   :  { %2572 = vmatprep.subr.bf16.mxu0 %v2814_v37  ;;  %v2870_v37 = vcombine.high %v855_v56, %v859_v32 }
 0x285   :  { %2491 = vmatpush1.bf16.msra.mxu1 %v2811_v42  ;;  %v2867_v42 = vcombine.low %v854_v27, %v858_v30  ;;  %v911_v27 = vld [vmem:[#allocation8 + $0x598] sm:$0xff] }
 0x286   :  { %2573 = vmatpush1.bf16.msra.mxu0 %v2813_v43  ;;  %2492 = vmatprep.subr.bf16.mxu1 %v2820_v44  ;;  %v2869_v43 = vcombine.low %v855_v56, %v859_v32  ;;  %v2876_v44 = vcombine.high %v862_v38, %v866_v39  ;;  %v915_v30 = vld [vmem:[#allocation8 + $0x5b8] sm:$0xff]  ;;  %v2917_v32 = vcombine.low %v903_v50, %v907_v20 }
 0x287   :  { %2574 = vmatprep.subr.bf16.mxu0 %v2822_v45  ;;  %v2878_v45 = vcombine.high %v863_v40, %v867_v41  ;;  %v919_v38 = vld [vmem:[#allocation8 + $0x5d8] sm:$0xff] }
 0x288   :  { %v923_v39 = vld [vmem:[#allocation8 + $0x5f8] sm:$0xff] }
 0x289   :  { %2493 = vmatpush1.bf16.msra.mxu1 %v2819_v52  ;;  %v875_v52 = vld [vmem:[#allocation8 + $0x478] sm:$0xff] }
 0x28a   :  { %2575 = vmatpush1.bf16.msra.mxu0 %v2821_v53  ;;  %2494 = vmatprep.subr.bf16.mxu1 %v2828_v54  ;;  %v2877_v53 = vcombine.low %v863_v40, %v867_v41  ;;  %v2884_v54 = vcombine.high %v870_v46, %v874_v47  ;;  %v2886_v58 = vcombine.high %v871_v49, %v875_v52 }
 0x28b   :  { %2576 = vmatprep.subr.bf16.mxu0 %v2830_v55  ;;  %v878_v55 = vld [vmem:[#allocation8 + $0x490] sm:$0xff]  ;;  %v2925_v41 = vcombine.low %v911_v27, %v915_v30 }
 0x28d   :  { %2495 = vmatpush1.bf16.msra.mxu1 %v2827_v61  ;;  %v2883_v61 = vcombine.low %v870_v46, %v874_v47  ;;  %v927_v46 = vld [vmem:[#allocation8 + $0x618] sm:$0xff] }
 0x28e   :  { %2577 = vmatpush1.bf16.msra.mxu0 %v2829_v62  ;;  %2496 = vmatprep.subr.bf16.mxu1 %v2836_v63  ;;  %v2885_v62 = vcombine.low %v871_v49, %v875_v52  ;;  %v2892_v63 = vcombine.high %v878_v55, %v882_v57  ;;  %v931_v47 = vld [vmem:[#allocation8 + $0x638] sm:$0xff]  ;;  %v2933_v49 = vcombine.low %v919_v38, %v923_v39 }
 0x28f   :  { %2578 = vmatprep.subr.bf16.mxu0 %v2838_v0  ;;  %v2894_v0 = vcombine.high %v879_v9, %v883_v60 }
 0x291   :  { %2497 = vmatpush1.bf16.msra.mxu1 %v2835_v5  ;;  %v2891_v5 = vcombine.low %v878_v55, %v882_v57  ;;  %v938_v55 = vld [vmem:[#allocation8 + $0x670] sm:$0xff]  ;;  %v935_v57 = vld [vmem:[#allocation8 + $0x658] sm:$0xff] }
 0x292   :  { %2579 = vmatpush1.bf16.msra.mxu0 %v2837_v6  ;;  %2498 = vmatprep.subr.bf16.mxu1 %v2844_v7  ;;  %v2900_v6 = vcombine.high %v886_v1, %v890_v2  ;;  %v2902_v7 = vcombine.high %v887_v3, %v891_v4 }
 0x293   :  { %2580 = vmatprep.subr.bf16.mxu0 %v2846_v8  ;;  %v894_v8 = vld [vmem:[#allocation8 + $0x510] sm:$0xff] }
 0x294   :  { %v2907_v21 = vcombine.low %v894_v8, %v898_v11 }
 0x295   :  { %2499 = vmatpush1.bf16.msra.mxu1 %v2843_v15  ;;  %v2908_v15 = vcombine.high %v894_v8, %v898_v11  ;;  %v951_v8 = vld [vmem:[#allocation8 + $0x6d8] sm:$0xff] }
 0x296   :  { %2581 = vmatpush1.bf16.msra.mxu0 %v2845_v16  ;;  %2500 = vmatprep.subr.bf16.mxu1 %v2852_v18  ;;  %v2910_v16 = vcombine.high %v895_v12, %v899_v13  ;;  %v902_v18 = vld [vmem:[#allocation8 + $0x550] sm:$0xff]  ;;  %v955_v11 = vld [vmem:[#allocation8 + $0x6f8] sm:$0xff] }
 0x297   :  { %2582 = vmatprep.subr.bf16.mxu0 %v2854_v19  ;;  %v906_v19 = vld [vmem:[#allocation8 + $0x570] sm:$0xff] }
 0x298   :  { %v2915_v56 = vcombine.low %v902_v18, %v906_v19 }
 0x299   :  { %2501 = vmatpush1.bf16.msra.mxu1 %v2851_v23  ;;  %v2916_v23 = vcombine.high %v902_v18, %v906_v19  ;;  %v959_v18 = vld [vmem:[#allocation8 + $0x718] sm:$0xff] }
 0x29a   :  { %2583 = vmatpush1.bf16.msra.mxu0 %v2853_v24  ;;  %2502 = vmatprep.subr.bf16.mxu1 %v2860_v25  ;;  %v2918_v24 = vcombine.high %v903_v50, %v907_v20  ;;  %v910_v25 = vld [vmem:[#allocation8 + $0x590] sm:$0xff]  ;;  %v963_v19 = vld [vmem:[#allocation8 + $0x738] sm:$0xff]  ;;  %v2965_v20 = vcombine.low %v951_v8, %v955_v11 }
 0x29b   :  { %2584 = vmatprep.subr.bf16.mxu0 %v2862_v26  ;;  %v914_v26 = vld [vmem:[#allocation8 + $0x5b0] sm:$0xff] }
 0x29c   :  { %v2923_v40 = vcombine.low %v910_v25, %v914_v26 }
 0x29d   :  { %2503 = vmatpush1.bf16.msra.mxu1 %v2859_v33  ;;  %v2924_v33 = vcombine.high %v910_v25, %v914_v26  ;;  %v967_v25 = vld [vmem:[#allocation8 + $0x758] sm:$0xff] }
 0x29e   :  { %2585 = vmatpush1.bf16.msra.mxu0 %v2861_v35  ;;  %2504 = vmatprep.subr.bf16.mxu1 %v2868_v36  ;;  %v2926_v35 = vcombine.high %v911_v27, %v915_v30  ;;  %v918_v36 = vld [vmem:[#allocation8 + $0x5d0] sm:$0xff]  ;;  %v971_v26 = vld [vmem:[#allocation8 + $0x778] sm:$0xff]  ;;  %v2973_v30 = vcombine.low %v959_v18, %v963_v19 }
 0x29f   :  { %2586 = vmatprep.subr.bf16.mxu0 %v2870_v37  ;;  %v922_v37 = vld [vmem:[#allocation8 + $0x5f0] sm:$0xff] }
 0x2a1   :  { %2505 = vmatpush1.bf16.msra.mxu1 %v2867_v42  ;;  %v2932_v42 = vcombine.high %v918_v36, %v922_v37 }
 0x2a2   :  { %2587 = vmatpush1.bf16.msra.mxu0 %v2869_v43  ;;  %2515 = vmatprep.subr.bf16.mxu1 %v2876_v44  ;;  %v2934_v43 = vcombine.high %v919_v38, %v923_v39  ;;  %v926_v44 = vld [vmem:[#allocation8 + $0x610] sm:$0xff]  ;;  %v2981_v39 = vcombine.low %v967_v25, %v971_v26 }
 0x2a3   :  { %2597 = vmatprep.subr.bf16.mxu0 %v2878_v45  ;;  %v930_v45 = vld [vmem:[#allocation8 + $0x630] sm:$0xff] }
 0x2a4   :  { %2507 = vmatmul.mubr.bf16.vlgmr.msra.gmra.mrb[8].mxu1 %v3403_v10  ;;  %v2940_v52 = vcombine.high %v926_v44, %v930_v45 }
 0x2a5   :  { %2589 = vmatmul.mubr.bf16.vlgmr.msra.gmra.mrb[12].mxu0 %v3403_v10  ;;  %2516 = vmatpush1.bf16.msra.mxu1 %v2875_v48  ;;  %v2893_v10 = vcombine.low %v879_v9, %v883_v60  ;;  %v2931_v48 = vcombine.low %v918_v36, %v922_v37  ;;  %v2939_v9 = vcombine.low %v926_v44, %v930_v45  ;;  %v975_v36 = vld [vmem:[#allocation8 + $0x798] sm:$0xff] }
 0x2a6   :  { %2547 = vmatprep.mubr.bf16.mxu1 %v3407_v17  ;;  %2598 = vmatpush1.bf16.msra.mxu0 %v2877_v53  ;;  %v2942_v53 = vcombine.high %v927_v46, %v931_v47  ;;  %v2941_v60 = vcombine.low %v927_v46, %v931_v47  ;;  %v979_v37 = vld [vmem:[#allocation8 + $0x7b8] sm:$0xff] }
 0x2a7   :  { %2629 = vmatprep.mubr.bf16.mxu0 %v3407_v17  ;;  %2517 = vmatprep.subr.bf16.mxu1 %v2884_v54  ;;  %v2899_v17 = vcombine.low %v886_v1, %v890_v2  ;;  %v934_v54 = vld [vmem:[#allocation8 + $0x650] sm:$0xff]  ;;  %v943_v1 = vld [vmem:[#allocation8 + $0x698] sm:$0xff]  ;;  %v2989_v47 = vcombine.low %v975_v36, %v979_v37 }
 0x2a8   :  { %2599 = vmatprep.subr.bf16.mxu0 %v2886_v58  ;;  %v939_v58 = vld [vmem:[#allocation8 + $0x678] sm:$0xff]  ;;  %v2947_v3 = vcombine.low %v934_v54, %v938_v55 }
 0x2a9   :  { %2518 = vmatpush1.bf16.msra.mxu1 %v2883_v61  ;;  %v2948_v61 = vcombine.high %v934_v54, %v938_v55  ;;  %v947_v2 = vld [vmem:[#allocation8 + $0x6b8] sm:$0xff]  ;;  %v2949_v4 = vcombine.low %v935_v57, %v939_v58 }
 0x2aa   :  { %2600 = vmatpush1.bf16.msra.mxu0 %v2885_v62  ;;  %2519 = vmatprep.subr.bf16.mxu1 %v2892_v63  ;;  %v2950_v62 = vcombine.high %v935_v57, %v939_v58  ;;  %v942_v63 = vld [vmem:[#allocation8 + $0x690] sm:$0xff]  ;;  %v2957_v13 = vcombine.low %v943_v1, %v947_v2  ;;  %v983_v44 = vld [vmem:[#allocation8 + $0x7d8] sm:$0xff] }
 0x2ab   :  { %2601 = vmatprep.subr.bf16.mxu0 %v2894_v0  ;;  %v946_v0 = vld [vmem:[#allocation8 + $0x6b0] sm:$0xff]  ;;  %v987_v45 = vld [vmem:[#allocation8 + $0x7f8] sm:$0xff] }
 0x2ac   :  { %v2955_v12 = vcombine.low %v942_v63, %v946_v0  ;;  %v988_v54 = vld [vmem:[%s3461_s6] sm:$0xff]  ;;  %s3284_s6 = smov [#allocation10]  }
 0x2ad   :  { %2520 = vmatpush1.bf16.msra.mxu1 %v2891_v5  ;;  %v2956_v5 = vcombine.high %v942_v63, %v946_v0  ;;  %v993_v55 = vrot.slane %v988_v54, %v3376_v29  ;;  %v1001_v57 = vrot.slane %v988_v54, %v312_v59  ;;  %v997_v58 = vrot.slane %v988_v54, %v3382_v31  ;;  %s2652_s8 = sshll.u32 %s3284_s6, 4  ;;  %s2653_s8 = int_to_ptr.vmem [resolvable:$true] %s2652_s8 }
 0x2ae   :  { %2602 = vmatpush1.bf16.msra.mxu0 %v2893_v10  ;;  %2521 = vmatprep.subr.bf16.mxu1 %v2900_v6  ;;  %v2958_v10 = vcombine.high %v943_v1, %v947_v2  ;;  %v950_v6 = vld [vmem:[#allocation8 + $0x6d0] sm:$0xff]  ;;  %v1008_v31 = vsub.s32 4, %v3373_v28  ;;  %v1012_v59 = vsub.s32 5, %v3373_v28  ;;  %s3243_s9 = scalar_lea.vmem %s2653_s8, 1024  ;;  %p3248_p5 = scmp.lt.s32.totalorder %s2653_s8, %s2653_s8 }
 0x2af   :  { %2603 = vmatprep.subr.bf16.mxu0 %v2902_v7  ;;  %v954_v7 = vld [vmem:[#allocation8 + $0x6f0] sm:$0xff]  ;;  %p3244_p4 = scmp.ne.s32.totalorder %s2653_s8, %s3243_s9  ;;  %p3249_p6 = scmp.lt.s32.totalorder %s3243_s9, %s3243_s9 }
 0x2b0   :  { %v2963_v50 = vcombine.low %v950_v6, %v954_v7 }
 0x2b1   :  { %2522 = vmatpush1.bf16.msra.mxu1 %v2899_v17  ;;  %v2964_v17 = vcombine.high %v950_v6, %v954_v7  ;;  %v1009_v6 = vrot.slane %v988_v54, %v1008_v31  ;;  %p3250_p7 = por %p3249_p6, %p3248_p5 }
 0x2b2   :  { %2604 = vmatpush1.bf16.msra.mxu0 %v2901_v14  ;;  %2523 = vmatprep.subr.bf16.mxu1 %v2908_v15  ;;  %v2966_v14 = vcombine.high %v951_v8, %v955_v11  ;;  %v958_v15 = vld [vmem:[#allocation8 + $0x710] sm:$0xff]  ;;  %v1013_v8 = vrot.slane %v988_v54, %v1012_v59 }
 0x2b3   :  { %2605 = vmatprep.subr.bf16.mxu0 %v2910_v16  ;;  %v962_v16 = vld [vmem:[#allocation8 + $0x730] sm:$0xff]  ;;  %p3251_p8 = pnand %p3250_p7, %p3244_p4 }
 0x2b4   :  { %v2971_v27 = vcombine.low %v958_v15, %v962_v16 }
 0x2b5   :  { %2524 = vmatpush1.bf16.msra.mxu1 %v2907_v21  ;;  %v2972_v21 = vcombine.high %v958_v15, %v962_v16 }
 0x2b6   :  { %2606 = vmatpush1.bf16.msra.mxu0 %v2909_v22  ;;  %2525 = vmatprep.subr.bf16.mxu1 %v2916_v23  ;;  %v2974_v22 = vcombine.high %v959_v18, %v963_v19  ;;  %v966_v23 = vld [vmem:[#allocation8 + $0x750] sm:$0xff] }
 0x2b7   :  { %2607 = vmatprep.subr.bf16.mxu0 %v2918_v24  ;;  %v970_v24 = vld [vmem:[#allocation8 + $0x770] sm:$0xff] }
 0x2b8   :  { %v2979_v38 = vcombine.low %v966_v23, %v970_v24 }
 0x2b9   :  { %2526 = vmatpush1.bf16.msra.mxu1 %v2915_v56  ;;  %v2980_v56 = vcombine.high %v966_v23, %v970_v24 }
 0x2ba   :  { %2608 = vmatpush1.bf16.msra.mxu0 %v2917_v32  ;;  %2527 = vmatprep.subr.bf16.mxu1 %v2924_v33  ;;  %v2982_v32 = vcombine.high %v967_v25, %v971_v26  ;;  %v974_v33 = vld [vmem:[#allocation8 + $0x790] sm:$0xff] }
 0x2bb   :  { %2609 = vmatprep.subr.bf16.mxu0 %v2926_v35  ;;  %v978_v35 = vld [vmem:[#allocation8 + $0x7b0] sm:$0xff] }
 0x2bc   :  { %v2987_v46 = vcombine.low %v974_v33, %v978_v35 }
 0x2bd   :  { %2528 = vmatpush1.bf16.msra.mxu1 %v2923_v40  ;;  %v2988_v40 = vcombine.high %v974_v33, %v978_v35 }
 0x2be   :  { %2610 = vmatpush1.bf16.msra.mxu0 %v2925_v41  ;;  %2529 = vmatprep.subr.bf16.mxu1 %v2932_v42  ;;  %v2990_v41 = vcombine.high %v975_v36, %v979_v37  ;;  %v982_v42 = vld [vmem:[#allocation8 + $0x7d0] sm:$0xff] }
 0x2bf   :  { %2611 = vmatprep.subr.bf16.mxu0 %v2934_v43  ;;  %v986_v43 = vld [vmem:[#allocation8 + $0x7f0] sm:$0xff] }
 0x2c1   :  { %2530 = vmatpush1.bf16.msra.mxu1 %v2931_v48  ;;  %v2996_v48 = vcombine.high %v982_v42, %v986_v43 }
 0x2c2   :  { %2612 = vmatpush1.bf16.msra.mxu0 %v2933_v49  ;;  %2531 = vmatprep.subr.bf16.mxu1 %v2940_v52  ;;  %v2998_v49 = vcombine.high %v983_v44, %v987_v45  ;;  %v2995_v52 = vcombine.low %v982_v42, %v986_v43 }
 0x2c3   :  { %2613 = vmatprep.subr.bf16.mxu0 %v2942_v53  ;;  %v2997_v53 = vcombine.low %v983_v44, %v987_v45 }
 0x2c5   :  { %2532 = vmatpush1.bf16.msra.mxu1 %v2939_v9  ;;  %v1005_v9 = vrot.slane %v988_v54, %v316_v51  ;;  %v1016_v51 = vsub.s32 6, %v3373_v28 }
 0x2c6   :  { %2614 = vmatpush1.bf16.msra.mxu0 %v2941_v60  ;;  %2533 = vmatprep.subr.bf16.mxu1 %v2948_v61 }
 0x2c7   :  { %2615 = vmatprep.subr.bf16.mxu0 %v2950_v62  ;;  %v1017_v7 = vrot.slane %v988_v54, %v1016_v51 }
 0x2c9   :  { %2534 = vmatpush1.bf16.msra.mxu1 %v2947_v3 }
 0x2ca   :  { %2616 = vmatpush1.bf16.msra.mxu0 %v2949_v4  ;;  %2535 = vmatprep.subr.bf16.mxu1 %v2956_v5 }
 0x2cb   :  { %2617 = vmatprep.subr.bf16.mxu0 %v2958_v10  ;;  %v1020_v10 = vsub.s32 7, %v3373_v28 }
 0x2cd   :  { %2536 = vmatpush1.bf16.msra.mxu1 %v2955_v12  ;;  %v1021_v11 = vrot.slane %v988_v54, %v1020_v10 }
 0x2ce   :  { %2618 = vmatpush1.bf16.msra.mxu0 %v2957_v13  ;;  %2537 = vmatprep.subr.bf16.mxu1 %v2964_v17 }
 0x2cf   :  { %2619 = vmatprep.subr.bf16.mxu0 %v2966_v14 }
 0x2d1   :  { %2538 = vmatpush1.bf16.msra.mxu1 %v2963_v50 }
 0x2d2   :  { %2620 = vmatpush1.bf16.msra.mxu0 %v2965_v20  ;;  %2539 = vmatprep.subr.bf16.mxu1 %v2972_v21 }
 0x2d3   :  { %2621 = vmatprep.subr.bf16.mxu0 %v2974_v22 }
 0x2d5   :  { %2540 = vmatpush1.bf16.msra.mxu1 %v2971_v27 }
 0x2d6   :  { %2622 = vmatpush1.bf16.msra.mxu0 %v2973_v30  ;;  %2541 = vmatprep.subr.bf16.mxu1 %v2980_v56 }
 0x2d7   :  { %2623 = vmatprep.subr.bf16.mxu0 %v2982_v32 }
 0x2d9   :  { %2542 = vmatpush1.bf16.msra.mxu1 %v2979_v38 }
 0x2da   :  { %2624 = vmatpush1.bf16.msra.mxu0 %v2981_v39  ;;  %2543 = vmatprep.subr.bf16.mxu1 %v2988_v40 }
 0x2db   :  { %2625 = vmatprep.subr.bf16.mxu0 %v2990_v41 }
 0x2dd   :  { %2544 = vmatpush1.bf16.msra.mxu1 %v2987_v46 }
 0x2de   :  { %2626 = vmatpush1.bf16.msra.mxu0 %v2989_v47  ;;  %2545 = vmatprep.subr.bf16.mxu1 %v2996_v48 }
 0x2df   :  { %2627 = vmatprep.subr.bf16.mxu0 %v2998_v49 }
 0x2e1   :  { %2546 = vmatpush1.bf16.msra.mxu1 %v2995_v52 }
 0x2e2   :  { %2628 = vmatpush1.bf16.msra.mxu0 %v2997_v53 }
 0x2e4   :  { %2548 = vmatmul.mubr.bf16.vlgmr.msra.gmra.mrb[8].mxu1 %v3418_v34 }
 0x2e5   :  { %2630 = vmatmul.mubr.bf16.vlgmr.msra.gmra.mrb[12].mxu0 %v3418_v34 }
 0x337   :  { %v2385_v60 = vpop.f32.mrb[4].mxu1  ;;  %v2467_v61 = vpop.f32.mrb[8].mxu0 }
 0x338   :  { %v2999_v62 = vadd.f32 %v2385_v60, %v993_v55  ;;  %v3001_v63 = vadd.f32 %v2467_v61, %v1001_v57  ;;  %v2387_v0 = vpop.f32.mrb[5].mxu1  ;;  %v2469_v34 = vpop.f32.mrb[9].mxu0 }
 0x339   :  { %v3000_v1 = vadd.f32 %v2387_v0, %v997_v58  ;;  %v3002_v2 = vadd.f32 %v2469_v34, %v1005_v9  ;;  %v2389_v3 = vpop.f32.mrb[6].mxu1  ;;  %v2471_v4 = vpop.f32.mrb[10].mxu0 }
 0x33a   :  { %2638 = vst [vmem:[#allocation10] sm:$0xff] %v2999_v62  ;;  %2640 = vst [vmem:[#allocation10 + $0x10] sm:$0xff] %v3001_v63  ;;  %v2390_v29 = vpop.f32.mrb[7].mxu1  ;;  %v2472_v5 = vpop.f32.mrb[11].mxu0 }
 0x33b   :  { %2639 = vst [vmem:[#allocation10 + $0x8] sm:$0xff] %v3000_v1  ;;  %2641 = vst [vmem:[#allocation10 + $0x18] sm:$0xff] %v3002_v2 }
 0x3b7   :  { %v2549_v12 = vpop.f32.mrb[8].mxu1 }
 0x3b8   :  { %v3003_v13 = vadd.f32 %v2549_v12, %v1009_v6  ;;  %v2631_v17 = vpop.f32.mrb[12].mxu0  ;;  %v2551_v14 = vpop.f32.mrb[9].mxu1 }
 0x3b9   :  { %v3005_v15 = vadd.f32 %v2631_v17, %v1017_v7  ;;  %v3004_v16 = vadd.f32 %v2551_v14, %v1013_v8  ;;  %v2633_v18 = vpop.f32.mrb[13].mxu0  ;;  %v2553_v19 = vpop.f32.mrb[10].mxu1 }
 0x3ba   :  { %2642 = vst [vmem:[#allocation10 + $0x20] sm:$0xff] %v3003_v13  ;;  %v3006_v50 = vadd.f32 %v2633_v18, %v1021_v11  ;;  %v2635_v20 = vpop.f32.mrb[14].mxu0  ;;  %v2554_v21 = vpop.f32.mrb[11].mxu1 }
 0x3bb   :  { %2644 = vst [vmem:[#allocation10 + $0x30] sm:$0xff] %v3005_v15  ;;  %2643 = vst [vmem:[#allocation10 + $0x28] sm:$0xff] %v3004_v16  ;;  %v2636_v28 = vpop.f32.mrb[15].mxu0 }
 0x3bc   :  { %2645 = vst [vmem:[#allocation10 + $0x38] sm:$0xff] %v3006_v50 }
 0x3bd   :  { %3254 = shalt.err (!%p3251_p8)
}
 0x3be   :  { %s3255_s12 = scalar_lea.hbm %s3462_s7, 1024 }
 0x3bf   :  { %p3256_p9 = scmp.ne.s32.totalorder %s3462_s7, %s3255_s12  ;;  %p3259_p10 = scmp.lt.u32.totalorder %s3255_s12, %s3462_s7 }
 0x3c1   :  { %p3261_p11 = pnand %p3259_p10, %p3256_p9 }
 0x3c3   :  { %3264 = shalt.err (!%p3261_p11)
}
 0x3c4   :  { %2655 = dma.vmem_to_hbm [thread:$0]  %s2653_s8, 1024, %s3462_s7, [#allocation4]  }
 0x3c5   :  { %3271 = dma.done.wait [#allocation4], 1024  }
 0x3c6   :  { %3272 = vsyncadd [#allocation4], 4294966272 }
 0x3c7   :  { %2659 = vsyncpa [#allocation3], 1 }
 0x3c8   :  { %2660 = vsyncpa [#allocation6], 1 }
 0x3c9   :  { %2661 = vsyncpa [#allocation9], 1 }
 0x3ca   :  { %2662 = vsyncpa [#allocation4], 1 }

</bundles_post_ra>
